<compile_context>
chip_gen: v7x
topology: tpu7x:2x2x1
jax: 0.10.0
libtpu: 0.0.40
codegen_flags: <defaults>
</compile_context>

<pallas_src>
import functools

import numpy as np
import jax
import jax.numpy as jnp
from jax import lax
from jax.experimental import pallas as pl
from jax.experimental.pallas import tpu as pltpu


def oil_lstm_kernel(x_ref, wih0_ref, b0_ref, wblk_ref, b1_ref, wd_ref, bd_ref,
                    out_ref, gx0_ref, h1all_ref, *, T, Bp, H):
    f32 = jnp.float32

    # --- prologue: layer-0 input projection for ALL timesteps at once --------
    # (one (T*Bp, I) x (I, 4H) matmul, off the serial chain; parked in VMEM)
    gx0_ref[...] = (jnp.dot(x_ref[...], wih0_ref[...],
                            preferred_element_type=f32) + b0_ref[...])

    # --- hoisted loop invariants ---------------------------------------------
    w_blk = wblk_ref[...]                                      # (2H, 8H)
    b1b = jnp.broadcast_to(b1_ref[...], (Bp, 4 * H))           # (Bp, 4H)

    # Post-activation scale/offset lane vectors (weights carry the 0.5
    # sigmoid pre-scale on i/f/o columns already):
    #   i/f/o lanes: sigmoid(z) = 0.5 * tanh(0.5 z) + 0.5
    #   g lanes    : tanh(z)
    lane = lax.broadcasted_iota(jnp.int32, (Bp, 4 * H), 1)
    is_g = (lane >= 2 * H) & (lane < 3 * H)
    post_scale = jnp.where(is_g, 1.0, 0.5).astype(f32)
    post_add = jnp.where(is_g, 0.0, 0.5).astype(f32)

    def activate(gates):
        # One EUP tanh over the whole (Bp, 4H) vreg + mul + add.
        return jnp.tanh(gates) * post_scale + post_add

    def cell(act, c):
        i = act[:, 0:H]
        f = act[:, H:2 * H]
        g = act[:, 2 * H:3 * H]
        o = act[:, 3 * H:4 * H]
        c_new = f * c + i * g
        return o * jnp.tanh(c_new), c_new

    h1 = jnp.zeros((Bp, H), f32)
    c0 = jnp.zeros((Bp, H), f32)
    c1 = jnp.zeros((Bp, H), f32)
    hh0 = None  # h0_{t-1} @ Whh0 — produced one step early by the fused matmul

    # --- fully unrolled recurrence (T static & small) -------------------------
    for t in range(T):
        # layer 0: gates = precomputed input projection (+ hidden term from the
        # previous step's fused matmul; zero at t == 0 so skip the add).
        g0 = gx0_ref[t * Bp:(t + 1) * Bp, :]
        if hh0 is not None:
            g0 = g0 + hh0
        h0, c0 = cell(activate(g0), c0)

        # ONE fused MXU matmul per step:
        #   [h0_t | h1_{t-1}] @ [[Whh0, Wih1], [0, Whh1]]  -> (Bp, 8H)
        lhs = jnp.concatenate([h0, h1], axis=1)                # (Bp, 2H)
        blk = jnp.dot(lhs, w_blk, preferred_element_type=f32)  # (Bp, 8H)

        hh0 = blk[:, :4 * H]          # layer-0 hidden term for step t+1 (vreg-aligned slice)
        g1 = blk[:, 4 * H:] + b1b     # layer-1 gates for step t
        h1, c1 = cell(activate(g1), c1)

        h1all_ref[t * Bp:(t + 1) * Bp, :] = h1

    # --- epilogue: dense + ReLU over all timesteps, lane-dense 128-wide store -
    y = jnp.dot(h1all_ref[...], wd_ref[...],
                preferred_element_type=f32) + bd_ref[...]
    out_ref[...] = jnp.maximum(y, 0.0)


def oil_model_forward(x, params):
    """x: (B, T, 3) float32 -> (B, T, 3) float32 (matches OilModel.forward)."""
    B, T, I = x.shape
    H = params["whh0"].shape[0]
    Bp = ((B + 7) // 8) * 8          # pad batch to one sublane group
    OUT_PAD = 128                    # lane-dense output width
    f32 = jnp.float32

    # ---- trace-time weight packing (free) ------------------------------------
    # Fold the sigmoid 0.5 pre-scale into the i/f/o gate columns (PyTorch gate
    # order i, f, g, o) of every gate weight AND bias.
    gate_scale = jnp.concatenate([
        jnp.full((2 * H,), 0.5, f32),    # i, f
        jnp.ones((H,), f32),             # g
        jnp.full((H,), 0.5, f32),        # o
    ])
    wih0_s = params["wih0"] * gate_scale
    whh0_s = params["whh0"] * gate_scale
    wih1_s = params["wih1"] * gate_scale
    whh1_s = params["whh1"] * gate_scale
    b0_s = params["b0"] * gate_scale
    b1_s = params["b1"] * gate_scale

    # Fused recurrence RHS: [[Whh0, Wih1], [0, Whh1]]  -> (2H, 8H)
    w_blk = jnp.concatenate([
        jnp.concatenate([whh0_s, wih1_s], axis=1),
        jnp.concatenate([jnp.zeros((H, 4 * H), f32), whh1_s], axis=1),
    ], axis=0)

    # Dense projection padded to 128 output lanes (unmasked lane-dense stores).
    wd_pad = jnp.pad(params["wd"], ((0, 0), (0, OUT_PAD - params["wd"].shape[1])))
    bd_pad = jnp.pad(params["bd"], ((0, 0), (0, OUT_PAD - params["bd"].shape[1])))

    # Time-major, batch-padded, flattened to (T*Bp, I).
    x_tm = jnp.transpose(x, (1, 0, 2))                         # (T, B, I)
    if Bp != B:
        x_tm = jnp.pad(x_tm, ((0, 0), (0, Bp - B), (0, 0)))
    x_flat = x_tm.reshape(T * Bp, I)

    kernel = functools.partial(oil_lstm_kernel, T=T, Bp=Bp, H=H)

    out_flat = pl.pallas_call(
        kernel,
        out_shape=jax.ShapeDtypeStruct((T * Bp, OUT_PAD), f32),
        in_specs=[pl.BlockSpec(memory_space=pltpu.MemorySpace.VMEM)
                  for _ in range(7)],
        out_specs=pl.BlockSpec(memory_space=pltpu.MemorySpace.VMEM),
        scratch_shapes=[pltpu.VMEM((T * Bp, 4 * H), f32),   # gates_x0 (kept off the vreg file)
                        pltpu.VMEM((T * Bp, H), f32)],      # all layer-1 hidden states
    )(x_flat, wih0_s, b0_s, w_blk, b1_s, wd_pad, bd_pad)

    out = out_flat.reshape(T, Bp, OUT_PAD)[:, :B, :3]
    return jnp.transpose(out, (1, 0, 2))                       # back to (B, T, 3)


def reference_forward(x, params):
    """Pure-JAX reference (same math as torch.nn.LSTM + Linear + ReLU)."""
    B, T, I = x.shape
    H = params["whh0"].shape[0]

    def cell(carry, x_t, wih, whh, b):
        h, c = carry
        gates = x_t @ wih + h @ whh + b
        i = jax.nn.sigmoid(gates[:, :H])
        f = jax.nn.sigmoid(gates[:, H:2 * H])
        g = jnp.tanh(gates[:, 2 * H:3 * H])
        o = jax.nn.sigmoid(gates[:, 3 * H:])
        c = f * c + i * g
        h = o * jnp.tanh(c)
        return (h, c), h

    x_tm = jnp.transpose(x, (1, 0, 2))

    def layer(x_seq, wih, whh, b):
        init = (jnp.zeros((B, H), jnp.float32), jnp.zeros((B, H), jnp.float32))
        _, hs = jax.lax.scan(lambda carry, xt: cell(carry, xt, wih, whh, b),
                             init, x_seq)
        return hs

    h0 = layer(x_tm, params["wih0"], params["whh0"], params["b0"])
    h1 = layer(h0, params["wih1"], params["whh1"], params["b1"])
    y = jnp.maximum(h1 @ params["wd"] + params["bd"], 0.0)
    return jnp.transpose(y, (1, 0, 2))


if __name__ == "__main__":
    B, T, I, H = 2, 12, 3, 32  # timesteps=12, units=32 from module defaults

    # Deterministic parameter init (shapes from nn.LSTM(3,32,2) / nn.Linear(32,3)).
    # Weights are stored pre-transposed for right-multiplication in the kernel.
    key = jax.random.PRNGKey(0)
    keys = jax.random.split(key, 11)
    scale = 1.0 / np.sqrt(H)

    def u(k, shape):
        return jax.random.uniform(k, shape, jnp.float32, -scale, scale)

    params = dict(
        wih0=u(keys[0], (I, 4 * H)),                          # weight_ih_l0.T
        whh0=u(keys[1], (H, 4 * H)),                          # weight_hh_l0.T
        b0=u(keys[2], (1, 4 * H)) + u(keys[3], (1, 4 * H)),   # bias_ih_l0+bias_hh_l0
        wih1=u(keys[4], (H, 4 * H)),                          # weight_ih_l1.T
        whh1=u(keys[5], (H, 4 * H)),                          # weight_hh_l1.T
        b1=u(keys[6], (1, 4 * H)) + u(keys[7], (1, 4 * H)),   # bias_ih_l1+bias_hh_l1
        wd=u(keys[8], (H, 3)),                                # dense.weight.T
        bd=u(keys[9], (1, 3)),                                # dense.bias
    )

    x = jax.random.normal(keys[10], (B, T, I), jnp.float32)

    fwd = jax.jit(oil_model_forward)
    out = jax.block_until_ready(fwd(x, params))
    ref = jax.block_until_ready(reference_forward(x, params))

    assert out.shape == (B, T, 3), out.shape
    err = np.max(np.abs(np.asarray(out) - np.asarray(ref)))
    assert np.allclose(np.asarray(out), np.asarray(ref), atol=3e-5, rtol=3e-5), err
    print("KERNEL_OK")
</pallas_src>

<mosaic_0001>
module attributes {stable_mosaic.version = 11 : i64} {
  func.func @oil_lstm_kernel(%arg0: memref<96x3xf32, #tpu.memory_space<vmem>>, %arg1: memref<3x128xf32, #tpu.memory_space<vmem>>, %arg2: memref<1x128xf32, #tpu.memory_space<vmem>>, %arg3: memref<64x256xf32, #tpu.memory_space<vmem>>, %arg4: memref<1x128xf32, #tpu.memory_space<vmem>>, %arg5: memref<32x128xf32, #tpu.memory_space<vmem>>, %arg6: memref<1x128xf32, #tpu.memory_space<vmem>>, %arg7: memref<96x128xf32, #tpu.memory_space<vmem>>, %arg8: memref<96x128xf32, #tpu.memory_space<vmem>>, %arg9: memref<96x32xf32, #tpu.memory_space<vmem>>) attributes {dimension_semantics = [], scalar_prefetch = 0 : i64, scratch_operands = 2 : i64, tpu.core_type = #tpu.core_type<tc>} {
    %c0 = arith.constant 0 : index
    %c0_0 = arith.constant 0 : index
    %0 = vector.load %arg0[%c0, %c0_0] : memref<96x3xf32, #tpu.memory_space<vmem>>, vector<96x3xf32>
    %c0_1 = arith.constant 0 : index
    %c0_2 = arith.constant 0 : index
    %1 = vector.load %arg1[%c0_1, %c0_2] : memref<3x128xf32, #tpu.memory_space<vmem>>, vector<3x128xf32>
    %cst = arith.constant dense<0.000000e+00> : vector<96x128xf32>
    %2 = tpu.matmul %0, %1, %cst {dimension_numbers = #tpu.dot_dimension_numbers<[1], [0], [0], [1], [0, 0, 1, 1], [], []>} : vector<96x3xf32>, vector<3x128xf32>, vector<96x128xf32> -> vector<96x128xf32>
    %c0_3 = arith.constant 0 : index
    %c0_4 = arith.constant 0 : index
    %3 = vector.load %arg2[%c0_3, %c0_4] : memref<1x128xf32, #tpu.memory_space<vmem>>, vector<1x128xf32>
    %4 = vector.broadcast %3 : vector<1x128xf32> to vector<96x128xf32>
    %5 = arith.addf %2, %4 : vector<96x128xf32>
    %c0_5 = arith.constant 0 : index
    %c0_6 = arith.constant 0 : index
    %6 = vector.load %arg8[%c0_5, %c0_6] : memref<96x128xf32, #tpu.memory_space<vmem>>, vector<96x128xf32>
    tpu.vector_store %arg8[%c0_5, %c0_6], %5 {strides = array<i32>} : memref<96x128xf32, #tpu.memory_space<vmem>>, vector<96x128xf32>,
    %c0_7 = arith.constant 0 : index
    %c0_8 = arith.constant 0 : index
    %7 = vector.load %arg3[%c0_7, %c0_8] : memref<64x256xf32, #tpu.memory_space<vmem>>, vector<64x256xf32>
    %c0_9 = arith.constant 0 : index
    %c0_10 = arith.constant 0 : index
    %8 = vector.load %arg4[%c0_9, %c0_10] : memref<1x128xf32, #tpu.memory_space<vmem>>, vector<1x128xf32>
    %9 = vector.shape_cast %8 : vector<1x128xf32> to vector<1x128xf32>
    %10 = vector.broadcast %9 : vector<1x128xf32> to vector<8x128xf32>
    %11 = tpu.iota {dimensions = array<i32: 1>} : vector<8x128xi32>
    %c64_i32 = arith.constant 64 : i32
    %12 = vector.broadcast %c64_i32 : i32 to vector<8x128xi32>
    %13 = arith.cmpi sge, %11, %12 : vector<8x128xi32>
    %c96_i32 = arith.constant 96 : i32
    %14 = vector.broadcast %c96_i32 : i32 to vector<8x128xi32>
    %15 = arith.cmpi slt, %11, %14 : vector<8x128xi32>
    %16 = arith.andi %13, %15 : vector<8x128xi1>
    %cst_11 = arith.constant 1.000000e+00 : f32
    %cst_12 = arith.constant 5.000000e-01 : f32
    %17 = vector.broadcast %cst_11 : f32 to vector<8x128xf32>
    %18 = vector.broadcast %cst_12 : f32 to vector<8x128xf32>
    %19 = arith.select %16, %17, %18 : vector<8x128xi1>, vector<8x128xf32>
    %cst_13 = arith.constant 0.000000e+00 : f32
    %cst_14 = arith.constant 5.000000e-01 : f32
    %20 = vector.broadcast %cst_13 : f32 to vector<8x128xf32>
    %21 = vector.broadcast %cst_14 : f32 to vector<8x128xf32>
    %22 = arith.select %16, %20, %21 : vector<8x128xi1>, vector<8x128xf32>
    %cst_15 = arith.constant 0.000000e+00 : f32
    %23 = vector.broadcast %cst_15 : f32 to vector<8x32xf32>
    %cst_16 = arith.constant 0.000000e+00 : f32
    %24 = vector.broadcast %cst_16 : f32 to vector<8x32xf32>
    %cst_17 = arith.constant 0.000000e+00 : f32
    %25 = vector.broadcast %cst_17 : f32 to vector<8x32xf32>
    %c0_18 = arith.constant 0 : index
    %c0_19 = arith.constant 0 : index
    %26 = vector.load %arg8[%c0_18, %c0_19] : memref<96x128xf32, #tpu.memory_space<vmem>>, vector<8x128xf32>
    %27 = math.tanh %26 : vector<8x128xf32>
    %28 = arith.mulf %27, %19 : vector<8x128xf32>
    %29 = arith.addf %28, %22 : vector<8x128xf32>
    %30 = vector.extract_strided_slice %29 {offsets = [0, 0], sizes = [8, 32], strides = [1, 1]} : vector<8x128xf32> to vector<8x32xf32>
    %31 = vector.extract_strided_slice %29 {offsets = [0, 32], sizes = [8, 32], strides = [1, 1]} : vector<8x128xf32> to vector<8x32xf32>
    %32 = vector.extract_strided_slice %29 {offsets = [0, 64], sizes = [8, 32], strides = [1, 1]} : vector<8x128xf32> to vector<8x32xf32>
    %33 = vector.extract_strided_slice %29 {offsets = [0, 96], sizes = [8, 32], strides = [1, 1]} : vector<8x128xf32> to vector<8x32xf32>
    %34 = arith.mulf %31, %24 : vector<8x32xf32>
    %35 = arith.mulf %30, %32 : vector<8x32xf32>
    %36 = arith.addf %34, %35 : vector<8x32xf32>
    %37 = math.tanh %36 : vector<8x32xf32>
    %38 = arith.mulf %33, %37 : vector<8x32xf32>
    %39 = tpu.concatenate %38, %23 in 1 : vector<8x32xf32>, vector<8x32xf32> -> vector<8x64xf32>
    %cst_20 = arith.constant dense<0.000000e+00> : vector<8x256xf32>
    %40 = tpu.matmul %39, %7, %cst_20 {dimension_numbers = #tpu.dot_dimension_numbers<[1], [0], [0], [1], [0, 0, 1, 1], [], []>} : vector<8x64xf32>, vector<64x256xf32>, vector<8x256xf32> -> vector<8x256xf32>
    %41 = vector.extract_strided_slice %40 {offsets = [0, 0], sizes = [8, 128], strides = [1, 1]} : vector<8x256xf32> to vector<8x128xf32>
    %42 = vector.extract_strided_slice %40 {offsets = [0, 128], sizes = [8, 128], strides = [1, 1]} : vector<8x256xf32> to vector<8x128xf32>
    %43 = arith.addf %42, %10 : vector<8x128xf32>
    %44 = math.tanh %43 : vector<8x128xf32>
    %45 = arith.mulf %44, %19 : vector<8x128xf32>
    %46 = arith.addf %45, %22 : vector<8x128xf32>
    %47 = vector.extract_strided_slice %46 {offsets = [0, 0], sizes = [8, 32], strides = [1, 1]} : vector<8x128xf32> to vector<8x32xf32>
    %48 = vector.extract_strided_slice %46 {offsets = [0, 32], sizes = [8, 32], strides = [1, 1]} : vector<8x128xf32> to vector<8x32xf32>
    %49 = vector.extract_strided_slice %46 {offsets = [0, 64], sizes = [8, 32], strides = [1, 1]} : vector<8x128xf32> to vector<8x32xf32>
    %50 = vector.extract_strided_slice %46 {offsets = [0, 96], sizes = [8, 32], strides = [1, 1]} : vector<8x128xf32> to vector<8x32xf32>
    %51 = arith.mulf %48, %25 : vector<8x32xf32>
    %52 = arith.mulf %47, %49 : vector<8x32xf32>
    %53 = arith.addf %51, %52 : vector<8x32xf32>
    %54 = math.tanh %53 : vector<8x32xf32>
    %55 = arith.mulf %50, %54 : vector<8x32xf32>
    %c0_21 = arith.constant 0 : index
    %c0_22 = arith.constant 0 : index
    %56 = vector.load %arg9[%c0_21, %c0_22] : memref<96x32xf32, #tpu.memory_space<vmem>>, vector<8x32xf32>
    tpu.vector_store %arg9[%c0_21, %c0_22], %55 {strides = array<i32>} : memref<96x32xf32, #tpu.memory_space<vmem>>, vector<8x32xf32>,
    %c8 = arith.constant 8 : index
    %c0_23 = arith.constant 0 : index
    %57 = vector.load %arg8[%c8, %c0_23] : memref<96x128xf32, #tpu.memory_space<vmem>>, vector<8x128xf32>
    %58 = arith.addf %57, %41 : vector<8x128xf32>
    %59 = math.tanh %58 : vector<8x128xf32>
    %60 = arith.mulf %59, %19 : vector<8x128xf32>
    %61 = arith.addf %60, %22 : vector<8x128xf32>
    %62 = vector.extract_strided_slice %61 {offsets = [0, 0], sizes = [8, 32], strides = [1, 1]} : vector<8x128xf32> to vector<8x32xf32>
    %63 = vector.extract_strided_slice %61 {offsets = [0, 32], sizes = [8, 32], strides = [1, 1]} : vector<8x128xf32> to vector<8x32xf32>
    %64 = vector.extract_strided_slice %61 {offsets = [0, 64], sizes = [8, 32], strides = [1, 1]} : vector<8x128xf32> to vector<8x32xf32>
    %65 = vector.extract_strided_slice %61 {offsets = [0, 96], sizes = [8, 32], strides = [1, 1]} : vector<8x128xf32> to vector<8x32xf32>
    %66 = arith.mulf %63, %36 : vector<8x32xf32>
    %67 = arith.mulf %62, %64 : vector<8x32xf32>
    %68 = arith.addf %66, %67 : vector<8x32xf32>
    %69 = math.tanh %68 : vector<8x32xf32>
    %70 = arith.mulf %65, %69 : vector<8x32xf32>
    %71 = tpu.concatenate %70, %55 in 1 : vector<8x32xf32>, vector<8x32xf32> -> vector<8x64xf32>
    %cst_24 = arith.constant dense<0.000000e+00> : vector<8x256xf32>
    %72 = tpu.matmul %71, %7, %cst_24 {dimension_numbers = #tpu.dot_dimension_numbers<[1], [0], [0], [1], [0, 0, 1, 1], [], []>} : vector<8x64xf32>, vector<64x256xf32>, vector<8x256xf32> -> vector<8x256xf32>
    %73 = vector.extract_strided_slice %72 {offsets = [0, 0], sizes = [8, 128], strides = [1, 1]} : vector<8x256xf32> to vector<8x128xf32>
    %74 = vector.extract_strided_slice %72 {offsets = [0, 128], sizes = [8, 128], strides = [1, 1]} : vector<8x256xf32> to vector<8x128xf32>
    %75 = arith.addf %74, %10 : vector<8x128xf32>
    %76 = math.tanh %75 : vector<8x128xf32>
    %77 = arith.mulf %76, %19 : vector<8x128xf32>
    %78 = arith.addf %77, %22 : vector<8x128xf32>
    %79 = vector.extract_strided_slice %78 {offsets = [0, 0], sizes = [8, 32], strides = [1, 1]} : vector<8x128xf32> to vector<8x32xf32>
    %80 = vector.extract_strided_slice %78 {offsets = [0, 32], sizes = [8, 32], strides = [1, 1]} : vector<8x128xf32> to vector<8x32xf32>
    %81 = vector.extract_strided_slice %78 {offsets = [0, 64], sizes = [8, 32], strides = [1, 1]} : vector<8x128xf32> to vector<8x32xf32>
    %82 = vector.extract_strided_slice %78 {offsets = [0, 96], sizes = [8, 32], strides = [1, 1]} : vector<8x128xf32> to vector<8x32xf32>
    %83 = arith.mulf %80, %53 : vector<8x32xf32>
    %84 = arith.mulf %79, %81 : vector<8x32xf32>
    %85 = arith.addf %83, %84 : vector<8x32xf32>
    %86 = math.tanh %85 : vector<8x32xf32>
    %87 = arith.mulf %82, %86 : vector<8x32xf32>
    %c8_25 = arith.constant 8 : index
    %c0_26 = arith.constant 0 : index
    %88 = vector.load %arg9[%c8_25, %c0_26] : memref<96x32xf32, #tpu.memory_space<vmem>>, vector<8x32xf32>
    tpu.vector_store %arg9[%c8_25, %c0_26], %87 {strides = array<i32>} : memref<96x32xf32, #tpu.memory_space<vmem>>, vector<8x32xf32>,
    %c16 = arith.constant 16 : index
    %c0_27 = arith.constant 0 : index
    %89 = vector.load %arg8[%c16, %c0_27] : memref<96x128xf32, #tpu.memory_space<vmem>>, vector<8x128xf32>
    %90 = arith.addf %89, %73 : vector<8x128xf32>
    %91 = math.tanh %90 : vector<8x128xf32>
    %92 = arith.mulf %91, %19 : vector<8x128xf32>
    %93 = arith.addf %92, %22 : vector<8x128xf32>
    %94 = vector.extract_strided_slice %93 {offsets = [0, 0], sizes = [8, 32], strides = [1, 1]} : vector<8x128xf32> to vector<8x32xf32>
    %95 = vector.extract_strided_slice %93 {offsets = [0, 32], sizes = [8, 32], strides = [1, 1]} : vector<8x128xf32> to vector<8x32xf32>
    %96 = vector.extract_strided_slice %93 {offsets = [0, 64], sizes = [8, 32], strides = [1, 1]} : vector<8x128xf32> to vector<8x32xf32>
    %97 = vector.extract_strided_slice %93 {offsets = [0, 96], sizes = [8, 32], strides = [1, 1]} : vector<8x128xf32> to vector<8x32xf32>
    %98 = arith.mulf %95, %68 : vector<8x32xf32>
    %99 = arith.mulf %94, %96 : vector<8x32xf32>
    %100 = arith.addf %98, %99 : vector<8x32xf32>
    %101 = math.tanh %100 : vector<8x32xf32>
    %102 = arith.mulf %97, %101 : vector<8x32xf32>
    %103 = tpu.concatenate %102, %87 in 1 : vector<8x32xf32>, vector<8x32xf32> -> vector<8x64xf32>
    %cst_28 = arith.constant dense<0.000000e+00> : vector<8x256xf32>
    %104 = tpu.matmul %103, %7, %cst_28 {dimension_numbers = #tpu.dot_dimension_numbers<[1], [0], [0], [1], [0, 0, 1, 1], [], []>} : vector<8x64xf32>, vector<64x256xf32>, vector<8x256xf32> -> vector<8x256xf32>
    %105 = vector.extract_strided_slice %104 {offsets = [0, 0], sizes = [8, 128], strides = [1, 1]} : vector<8x256xf32> to vector<8x128xf32>
    %106 = vector.extract_strided_slice %104 {offsets = [0, 128], sizes = [8, 128], strides = [1, 1]} : vector<8x256xf32> to vector<8x128xf32>
    %107 = arith.addf %106, %10 : vector<8x128xf32>
    %108 = math.tanh %107 : vector<8x128xf32>
    %109 = arith.mulf %108, %19 : vector<8x128xf32>
    %110 = arith.addf %109, %22 : vector<8x128xf32>
    %111 = vector.extract_strided_slice %110 {offsets = [0, 0], sizes = [8, 32], strides = [1, 1]} : vector<8x128xf32> to vector<8x32xf32>
    %112 = vector.extract_strided_slice %110 {offsets = [0, 32], sizes = [8, 32], strides = [1, 1]} : vector<8x128xf32> to vector<8x32xf32>
    %113 = vector.extract_strided_slice %110 {offsets = [0, 64], sizes = [8, 32], strides = [1, 1]} : vector<8x128xf32> to vector<8x32xf32>
    %114 = vector.extract_strided_slice %110 {offsets = [0, 96], sizes = [8, 32], strides = [1, 1]} : vector<8x128xf32> to vector<8x32xf32>
    %115 = arith.mulf %112, %85 : vector<8x32xf32>
    %116 = arith.mulf %111, %113 : vector<8x32xf32>
    %117 = arith.addf %115, %116 : vector<8x32xf32>
    %118 = math.tanh %117 : vector<8x32xf32>
    %119 = arith.mulf %114, %118 : vector<8x32xf32>
    %c16_29 = arith.constant 16 : index
    %c0_30 = arith.constant 0 : index
    %120 = vector.load %arg9[%c16_29, %c0_30] : memref<96x32xf32, #tpu.memory_space<vmem>>, vector<8x32xf32>
    tpu.vector_store %arg9[%c16_29, %c0_30], %119 {strides = array<i32>} : memref<96x32xf32, #tpu.memory_space<vmem>>, vector<8x32xf32>,
    %c24 = arith.constant 24 : index
    %c0_31 = arith.constant 0 : index
    %121 = vector.load %arg8[%c24, %c0_31] : memref<96x128xf32, #tpu.memory_space<vmem>>, vector<8x128xf32>
    %122 = arith.addf %121, %105 : vector<8x128xf32>
    %123 = math.tanh %122 : vector<8x128xf32>
    %124 = arith.mulf %123, %19 : vector<8x128xf32>
    %125 = arith.addf %124, %22 : vector<8x128xf32>
    %126 = vector.extract_strided_slice %125 {offsets = [0, 0], sizes = [8, 32], strides = [1, 1]} : vector<8x128xf32> to vector<8x32xf32>
    %127 = vector.extract_strided_slice %125 {offsets = [0, 32], sizes = [8, 32], strides = [1, 1]} : vector<8x128xf32> to vector<8x32xf32>
    %128 = vector.extract_strided_slice %125 {offsets = [0, 64], sizes = [8, 32], strides = [1, 1]} : vector<8x128xf32> to vector<8x32xf32>
    %129 = vector.extract_strided_slice %125 {offsets = [0, 96], sizes = [8, 32], strides = [1, 1]} : vector<8x128xf32> to vector<8x32xf32>
    %130 = arith.mulf %127, %100 : vector<8x32xf32>
    %131 = arith.mulf %126, %128 : vector<8x32xf32>
    %132 = arith.addf %130, %131 : vector<8x32xf32>
    %133 = math.tanh %132 : vector<8x32xf32>
    %134 = arith.mulf %129, %133 : vector<8x32xf32>
    %135 = tpu.concatenate %134, %119 in 1 : vector<8x32xf32>, vector<8x32xf32> -> vector<8x64xf32>
    %cst_32 = arith.constant dense<0.000000e+00> : vector<8x256xf32>
    %136 = tpu.matmul %135, %7, %cst_32 {dimension_numbers = #tpu.dot_dimension_numbers<[1], [0], [0], [1], [0, 0, 1, 1], [], []>} : vector<8x64xf32>, vector<64x256xf32>, vector<8x256xf32> -> vector<8x256xf32>
    %137 = vector.extract_strided_slice %136 {offsets = [0, 0], sizes = [8, 128], strides = [1, 1]} : vector<8x256xf32> to vector<8x128xf32>
    %138 = vector.extract_strided_slice %136 {offsets = [0, 128], sizes = [8, 128], strides = [1, 1]} : vector<8x256xf32> to vector<8x128xf32>
    %139 = arith.addf %138, %10 : vector<8x128xf32>
    %140 = math.tanh %139 : vector<8x128xf32>
    %141 = arith.mulf %140, %19 : vector<8x128xf32>
    %142 = arith.addf %141, %22 : vector<8x128xf32>
    %143 = vector.extract_strided_slice %142 {offsets = [0, 0], sizes = [8, 32], strides = [1, 1]} : vector<8x128xf32> to vector<8x32xf32>
    %144 = vector.extract_strided_slice %142 {offsets = [0, 32], sizes = [8, 32], strides = [1, 1]} : vector<8x128xf32> to vector<8x32xf32>
    %145 = vector.extract_strided_slice %142 {offsets = [0, 64], sizes = [8, 32], strides = [1, 1]} : vector<8x128xf32> to vector<8x32xf32>
    %146 = vector.extract_strided_slice %142 {offsets = [0, 96], sizes = [8, 32], strides = [1, 1]} : vector<8x128xf32> to vector<8x32xf32>
    %147 = arith.mulf %144, %117 : vector<8x32xf32>
    %148 = arith.mulf %143, %145 : vector<8x32xf32>
    %149 = arith.addf %147, %148 : vector<8x32xf32>
    %150 = math.tanh %149 : vector<8x32xf32>
    %151 = arith.mulf %146, %150 : vector<8x32xf32>
    %c24_33 = arith.constant 24 : index
    %c0_34 = arith.constant 0 : index
    %152 = vector.load %arg9[%c24_33, %c0_34] : memref<96x32xf32, #tpu.memory_space<vmem>>, vector<8x32xf32>
    tpu.vector_store %arg9[%c24_33, %c0_34], %151 {strides = array<i32>} : memref<96x32xf32, #tpu.memory_space<vmem>>, vector<8x32xf32>,
    %c32 = arith.constant 32 : index
    %c0_35 = arith.constant 0 : index
    %153 = vector.load %arg8[%c32, %c0_35] : memref<96x128xf32, #tpu.memory_space<vmem>>, vector<8x128xf32>
    %154 = arith.addf %153, %137 : vector<8x128xf32>
    %155 = math.tanh %154 : vector<8x128xf32>
    %156 = arith.mulf %155, %19 : vector<8x128xf32>
    %157 = arith.addf %156, %22 : vector<8x128xf32>
    %158 = vector.extract_strided_slice %157 {offsets = [0, 0], sizes = [8, 32], strides = [1, 1]} : vector<8x128xf32> to vector<8x32xf32>
    %159 = vector.extract_strided_slice %157 {offsets = [0, 32], sizes = [8, 32], strides = [1, 1]} : vector<8x128xf32> to vector<8x32xf32>
    %160 = vector.extract_strided_slice %157 {offsets = [0, 64], sizes = [8, 32], strides = [1, 1]} : vector<8x128xf32> to vector<8x32xf32>
    %161 = vector.extract_strided_slice %157 {offsets = [0, 96], sizes = [8, 32], strides = [1, 1]} : vector<8x128xf32> to vector<8x32xf32>
    %162 = arith.mulf %159, %132 : vector<8x32xf32>
    %163 = arith.mulf %158, %160 : vector<8x32xf32>
    %164 = arith.addf %162, %163 : vector<8x32xf32>
    %165 = math.tanh %164 : vector<8x32xf32>
    %166 = arith.mulf %161, %165 : vector<8x32xf32>
    %167 = tpu.concatenate %166, %151 in 1 : vector<8x32xf32>, vector<8x32xf32> -> vector<8x64xf32>
    %cst_36 = arith.constant dense<0.000000e+00> : vector<8x256xf32>
    %168 = tpu.matmul %167, %7, %cst_36 {dimension_numbers = #tpu.dot_dimension_numbers<[1], [0], [0], [1], [0, 0, 1, 1], [], []>} : vector<8x64xf32>, vector<64x256xf32>, vector<8x256xf32> -> vector<8x256xf32>
    %169 = vector.extract_strided_slice %168 {offsets = [0, 0], sizes = [8, 128], strides = [1, 1]} : vector<8x256xf32> to vector<8x128xf32>
    %170 = vector.extract_strided_slice %168 {offsets = [0, 128], sizes = [8, 128], strides = [1, 1]} : vector<8x256xf32> to vector<8x128xf32>
    %171 = arith.addf %170, %10 : vector<8x128xf32>
    %172 = math.tanh %171 : vector<8x128xf32>
    %173 = arith.mulf %172, %19 : vector<8x128xf32>
    %174 = arith.addf %173, %22 : vector<8x128xf32>
    %175 = vector.extract_strided_slice %174 {offsets = [0, 0], sizes = [8, 32], strides = [1, 1]} : vector<8x128xf32> to vector<8x32xf32>
    %176 = vector.extract_strided_slice %174 {offsets = [0, 32], sizes = [8, 32], strides = [1, 1]} : vector<8x128xf32> to vector<8x32xf32>
    %177 = vector.extract_strided_slice %174 {offsets = [0, 64], sizes = [8, 32], strides = [1, 1]} : vector<8x128xf32> to vector<8x32xf32>
    %178 = vector.extract_strided_slice %174 {offsets = [0, 96], sizes = [8, 32], strides = [1, 1]} : vector<8x128xf32> to vector<8x32xf32>
    %179 = arith.mulf %176, %149 : vector<8x32xf32>
    %180 = arith.mulf %175, %177 : vector<8x32xf32>
    %181 = arith.addf %179, %180 : vector<8x32xf32>
    %182 = math.tanh %181 : vector<8x32xf32>
    %183 = arith.mulf %178, %182 : vector<8x32xf32>
    %c32_37 = arith.constant 32 : index
    %c0_38 = arith.constant 0 : index
    %184 = vector.load %arg9[%c32_37, %c0_38] : memref<96x32xf32, #tpu.memory_space<vmem>>, vector<8x32xf32>
    tpu.vector_store %arg9[%c32_37, %c0_38], %183 {strides = array<i32>} : memref<96x32xf32, #tpu.memory_space<vmem>>, vector<8x32xf32>,
    %c40 = arith.constant 40 : index
    %c0_39 = arith.constant 0 : index
    %185 = vector.load %arg8[%c40, %c0_39] : memref<96x128xf32, #tpu.memory_space<vmem>>, vector<8x128xf32>
    %186 = arith.addf %185, %169 : vector<8x128xf32>
    %187 = math.tanh %186 : vector<8x128xf32>
    %188 = arith.mulf %187, %19 : vector<8x128xf32>
    %189 = arith.addf %188, %22 : vector<8x128xf32>
    %190 = vector.extract_strided_slice %189 {offsets = [0, 0], sizes = [8, 32], strides = [1, 1]} : vector<8x128xf32> to vector<8x32xf32>
    %191 = vector.extract_strided_slice %189 {offsets = [0, 32], sizes = [8, 32], strides = [1, 1]} : vector<8x128xf32> to vector<8x32xf32>
    %192 = vector.extract_strided_slice %189 {offsets = [0, 64], sizes = [8, 32], strides = [1, 1]} : vector<8x128xf32> to vector<8x32xf32>
    %193 = vector.extract_strided_slice %189 {offsets = [0, 96], sizes = [8, 32], strides = [1, 1]} : vector<8x128xf32> to vector<8x32xf32>
    %194 = arith.mulf %191, %164 : vector<8x32xf32>
    %195 = arith.mulf %190, %192 : vector<8x32xf32>
    %196 = arith.addf %194, %195 : vector<8x32xf32>
    %197 = math.tanh %196 : vector<8x32xf32>
    %198 = arith.mulf %193, %197 : vector<8x32xf32>
    %199 = tpu.concatenate %198, %183 in 1 : vector<8x32xf32>, vector<8x32xf32> -> vector<8x64xf32>
    %cst_40 = arith.constant dense<0.000000e+00> : vector<8x256xf32>
    %200 = tpu.matmul %199, %7, %cst_40 {dimension_numbers = #tpu.dot_dimension_numbers<[1], [0], [0], [1], [0, 0, 1, 1], [], []>} : vector<8x64xf32>, vector<64x256xf32>, vector<8x256xf32> -> vector<8x256xf32>
    %201 = vector.extract_strided_slice %200 {offsets = [0, 0], sizes = [8, 128], strides = [1, 1]} : vector<8x256xf32> to vector<8x128xf32>
    %202 = vector.extract_strided_slice %200 {offsets = [0, 128], sizes = [8, 128], strides = [1, 1]} : vector<8x256xf32> to vector<8x128xf32>
    %203 = arith.addf %202, %10 : vector<8x128xf32>
    %204 = math.tanh %203 : vector<8x128xf32>
    %205 = arith.mulf %204, %19 : vector<8x128xf32>
    %206 = arith.addf %205, %22 : vector<8x128xf32>
    %207 = vector.extract_strided_slice %206 {offsets = [0, 0], sizes = [8, 32], strides = [1, 1]} : vector<8x128xf32> to vector<8x32xf32>
    %208 = vector.extract_strided_slice %206 {offsets = [0, 32], sizes = [8, 32], strides = [1, 1]} : vector<8x128xf32> to vector<8x32xf32>
    %209 = vector.extract_strided_slice %206 {offsets = [0, 64], sizes = [8, 32], strides = [1, 1]} : vector<8x128xf32> to vector<8x32xf32>
    %210 = vector.extract_strided_slice %206 {offsets = [0, 96], sizes = [8, 32], strides = [1, 1]} : vector<8x128xf32> to vector<8x32xf32>
    %211 = arith.mulf %208, %181 : vector<8x32xf32>
    %212 = arith.mulf %207, %209 : vector<8x32xf32>
    %213 = arith.addf %211, %212 : vector<8x32xf32>
    %214 = math.tanh %213 : vector<8x32xf32>
    %215 = arith.mulf %210, %214 : vector<8x32xf32>
    %c40_41 = arith.constant 40 : index
    %c0_42 = arith.constant 0 : index
    %216 = vector.load %arg9[%c40_41, %c0_42] : memref<96x32xf32, #tpu.memory_space<vmem>>, vector<8x32xf32>
    tpu.vector_store %arg9[%c40_41, %c0_42], %215 {strides = array<i32>} : memref<96x32xf32, #tpu.memory_space<vmem>>, vector<8x32xf32>,
    %c48 = arith.constant 48 : index
    %c0_43 = arith.constant 0 : index
    %217 = vector.load %arg8[%c48, %c0_43] : memref<96x128xf32, #tpu.memory_space<vmem>>, vector<8x128xf32>
    %218 = arith.addf %217, %201 : vector<8x128xf32>
    %219 = math.tanh %218 : vector<8x128xf32>
    %220 = arith.mulf %219, %19 : vector<8x128xf32>
    %221 = arith.addf %220, %22 : vector<8x128xf32>
    %222 = vector.extract_strided_slice %221 {offsets = [0, 0], sizes = [8, 32], strides = [1, 1]} : vector<8x128xf32> to vector<8x32xf32>
    %223 = vector.extract_strided_slice %221 {offsets = [0, 32], sizes = [8, 32], strides = [1, 1]} : vector<8x128xf32> to vector<8x32xf32>
    %224 = vector.extract_strided_slice %221 {offsets = [0, 64], sizes = [8, 32], strides = [1, 1]} : vector<8x128xf32> to vector<8x32xf32>
    %225 = vector.extract_strided_slice %221 {offsets = [0, 96], sizes = [8, 32], strides = [1, 1]} : vector<8x128xf32> to vector<8x32xf32>
    %226 = arith.mulf %223, %196 : vector<8x32xf32>
    %227 = arith.mulf %222, %224 : vector<8x32xf32>
    %228 = arith.addf %226, %227 : vector<8x32xf32>
    %229 = math.tanh %228 : vector<8x32xf32>
    %230 = arith.mulf %225, %229 : vector<8x32xf32>
    %231 = tpu.concatenate %230, %215 in 1 : vector<8x32xf32>, vector<8x32xf32> -> vector<8x64xf32>
    %cst_44 = arith.constant dense<0.000000e+00> : vector<8x256xf32>
    %232 = tpu.matmul %231, %7, %cst_44 {dimension_numbers = #tpu.dot_dimension_numbers<[1], [0], [0], [1], [0, 0, 1, 1], [], []>} : vector<8x64xf32>, vector<64x256xf32>, vector<8x256xf32> -> vector<8x256xf32>
    %233 = vector.extract_strided_slice %232 {offsets = [0, 0], sizes = [8, 128], strides = [1, 1]} : vector<8x256xf32> to vector<8x128xf32>
    %234 = vector.extract_strided_slice %232 {offsets = [0, 128], sizes = [8, 128], strides = [1, 1]} : vector<8x256xf32> to vector<8x128xf32>
    %235 = arith.addf %234, %10 : vector<8x128xf32>
    %236 = math.tanh %235 : vector<8x128xf32>
    %237 = arith.mulf %236, %19 : vector<8x128xf32>
    %238 = arith.addf %237, %22 : vector<8x128xf32>
    %239 = vector.extract_strided_slice %238 {offsets = [0, 0], sizes = [8, 32], strides = [1, 1]} : vector<8x128xf32> to vector<8x32xf32>
    %240 = vector.extract_strided_slice %238 {offsets = [0, 32], sizes = [8, 32], strides = [1, 1]} : vector<8x128xf32> to vector<8x32xf32>
    %241 = vector.extract_strided_slice %238 {offsets = [0, 64], sizes = [8, 32], strides = [1, 1]} : vector<8x128xf32> to vector<8x32xf32>
    %242 = vector.extract_strided_slice %238 {offsets = [0, 96], sizes = [8, 32], strides = [1, 1]} : vector<8x128xf32> to vector<8x32xf32>
    %243 = arith.mulf %240, %213 : vector<8x32xf32>
    %244 = arith.mulf %239, %241 : vector<8x32xf32>
    %245 = arith.addf %243, %244 : vector<8x32xf32>
    %246 = math.tanh %245 : vector<8x32xf32>
    %247 = arith.mulf %242, %246 : vector<8x32xf32>
    %c48_45 = arith.constant 48 : index
    %c0_46 = arith.constant 0 : index
    %248 = vector.load %arg9[%c48_45, %c0_46] : memref<96x32xf32, #tpu.memory_space<vmem>>, vector<8x32xf32>
    tpu.vector_store %arg9[%c48_45, %c0_46], %247 {strides = array<i32>} : memref<96x32xf32, #tpu.memory_space<vmem>>, vector<8x32xf32>,
    %c56 = arith.constant 56 : index
    %c0_47 = arith.constant 0 : index
    %249 = vector.load %arg8[%c56, %c0_47] : memref<96x128xf32, #tpu.memory_space<vmem>>, vector<8x128xf32>
    %250 = arith.addf %249, %233 : vector<8x128xf32>
    %251 = math.tanh %250 : vector<8x128xf32>
    %252 = arith.mulf %251, %19 : vector<8x128xf32>
    %253 = arith.addf %252, %22 : vector<8x128xf32>
    %254 = vector.extract_strided_slice %253 {offsets = [0, 0], sizes = [8, 32], strides = [1, 1]} : vector<8x128xf32> to vector<8x32xf32>
    %255 = vector.extract_strided_slice %253 {offsets = [0, 32], sizes = [8, 32], strides = [1, 1]} : vector<8x128xf32> to vector<8x32xf32>
    %256 = vector.extract_strided_slice %253 {offsets = [0, 64], sizes = [8, 32], strides = [1, 1]} : vector<8x128xf32> to vector<8x32xf32>
    %257 = vector.extract_strided_slice %253 {offsets = [0, 96], sizes = [8, 32], strides = [1, 1]} : vector<8x128xf32> to vector<8x32xf32>
    %258 = arith.mulf %255, %228 : vector<8x32xf32>
    %259 = arith.mulf %254, %256 : vector<8x32xf32>
    %260 = arith.addf %258, %259 : vector<8x32xf32>
    %261 = math.tanh %260 : vector<8x32xf32>
    %262 = arith.mulf %257, %261 : vector<8x32xf32>
    %263 = tpu.concatenate %262, %247 in 1 : vector<8x32xf32>, vector<8x32xf32> -> vector<8x64xf32>
    %cst_48 = arith.constant dense<0.000000e+00> : vector<8x256xf32>
    %264 = tpu.matmul %263, %7, %cst_48 {dimension_numbers = #tpu.dot_dimension_numbers<[1], [0], [0], [1], [0, 0, 1, 1], [], []>} : vector<8x64xf32>, vector<64x256xf32>, vector<8x256xf32> -> vector<8x256xf32>
    %265 = vector.extract_strided_slice %264 {offsets = [0, 0], sizes = [8, 128], strides = [1, 1]} : vector<8x256xf32> to vector<8x128xf32>
    %266 = vector.extract_strided_slice %264 {offsets = [0, 128], sizes = [8, 128], strides = [1, 1]} : vector<8x256xf32> to vector<8x128xf32>
    %267 = arith.addf %266, %10 : vector<8x128xf32>
    %268 = math.tanh %267 : vector<8x128xf32>
    %269 = arith.mulf %268, %19 : vector<8x128xf32>
    %270 = arith.addf %269, %22 : vector<8x128xf32>
    %271 = vector.extract_strided_slice %270 {offsets = [0, 0], sizes = [8, 32], strides = [1, 1]} : vector<8x128xf32> to vector<8x32xf32>
    %272 = vector.extract_strided_slice %270 {offsets = [0, 32], sizes = [8, 32], strides = [1, 1]} : vector<8x128xf32> to vector<8x32xf32>
    %273 = vector.extract_strided_slice %270 {offsets = [0, 64], sizes = [8, 32], strides = [1, 1]} : vector<8x128xf32> to vector<8x32xf32>
    %274 = vector.extract_strided_slice %270 {offsets = [0, 96], sizes = [8, 32], strides = [1, 1]} : vector<8x128xf32> to vector<8x32xf32>
    %275 = arith.mulf %272, %245 : vector<8x32xf32>
    %276 = arith.mulf %271, %273 : vector<8x32xf32>
    %277 = arith.addf %275, %276 : vector<8x32xf32>
    %278 = math.tanh %277 : vector<8x32xf32>
    %279 = arith.mulf %274, %278 : vector<8x32xf32>
    %c56_49 = arith.constant 56 : index
    %c0_50 = arith.constant 0 : index
    %280 = vector.load %arg9[%c56_49, %c0_50] : memref<96x32xf32, #tpu.memory_space<vmem>>, vector<8x32xf32>
    tpu.vector_store %arg9[%c56_49, %c0_50], %279 {strides = array<i32>} : memref<96x32xf32, #tpu.memory_space<vmem>>, vector<8x32xf32>,
    %c64 = arith.constant 64 : index
    %c0_51 = arith.constant 0 : index
    %281 = vector.load %arg8[%c64, %c0_51] : memref<96x128xf32, #tpu.memory_space<vmem>>, vector<8x128xf32>
    %282 = arith.addf %281, %265 : vector<8x128xf32>
    %283 = math.tanh %282 : vector<8x128xf32>
    %284 = arith.mulf %283, %19 : vector<8x128xf32>
    %285 = arith.addf %284, %22 : vector<8x128xf32>
    %286 = vector.extract_strided_slice %285 {offsets = [0, 0], sizes = [8, 32], strides = [1, 1]} : vector<8x128xf32> to vector<8x32xf32>
    %287 = vector.extract_strided_slice %285 {offsets = [0, 32], sizes = [8, 32], strides = [1, 1]} : vector<8x128xf32> to vector<8x32xf32>
    %288 = vector.extract_strided_slice %285 {offsets = [0, 64], sizes = [8, 32], strides = [1, 1]} : vector<8x128xf32> to vector<8x32xf32>
    %289 = vector.extract_strided_slice %285 {offsets = [0, 96], sizes = [8, 32], strides = [1, 1]} : vector<8x128xf32> to vector<8x32xf32>
    %290 = arith.mulf %287, %260 : vector<8x32xf32>
    %291 = arith.mulf %286, %288 : vector<8x32xf32>
    %292 = arith.addf %290, %291 : vector<8x32xf32>
    %293 = math.tanh %292 : vector<8x32xf32>
    %294 = arith.mulf %289, %293 : vector<8x32xf32>
    %295 = tpu.concatenate %294, %279 in 1 : vector<8x32xf32>, vector<8x32xf32> -> vector<8x64xf32>
    %cst_52 = arith.constant dense<0.000000e+00> : vector<8x256xf32>
    %296 = tpu.matmul %295, %7, %cst_52 {dimension_numbers = #tpu.dot_dimension_numbers<[1], [0], [0], [1], [0, 0, 1, 1], [], []>} : vector<8x64xf32>, vector<64x256xf32>, vector<8x256xf32> -> vector<8x256xf32>
    %297 = vector.extract_strided_slice %296 {offsets = [0, 0], sizes = [8, 128], strides = [1, 1]} : vector<8x256xf32> to vector<8x128xf32>
    %298 = vector.extract_strided_slice %296 {offsets = [0, 128], sizes = [8, 128], strides = [1, 1]} : vector<8x256xf32> to vector<8x128xf32>
    %299 = arith.addf %298, %10 : vector<8x128xf32>
    %300 = math.tanh %299 : vector<8x128xf32>
    %301 = arith.mulf %300, %19 : vector<8x128xf32>
    %302 = arith.addf %301, %22 : vector<8x128xf32>
    %303 = vector.extract_strided_slice %302 {offsets = [0, 0], sizes = [8, 32], strides = [1, 1]} : vector<8x128xf32> to vector<8x32xf32>
    %304 = vector.extract_strided_slice %302 {offsets = [0, 32], sizes = [8, 32], strides = [1, 1]} : vector<8x128xf32> to vector<8x32xf32>
    %305 = vector.extract_strided_slice %302 {offsets = [0, 64], sizes = [8, 32], strides = [1, 1]} : vector<8x128xf32> to vector<8x32xf32>
    %306 = vector.extract_strided_slice %302 {offsets = [0, 96], sizes = [8, 32], strides = [1, 1]} : vector<8x128xf32> to vector<8x32xf32>
    %307 = arith.mulf %304, %277 : vector<8x32xf32>
    %308 = arith.mulf %303, %305 : vector<8x32xf32>
    %309 = arith.addf %307, %308 : vector<8x32xf32>
    %310 = math.tanh %309 : vector<8x32xf32>
    %311 = arith.mulf %306, %310 : vector<8x32xf32>
    %c64_53 = arith.constant 64 : index
    %c0_54 = arith.constant 0 : index
    %312 = vector.load %arg9[%c64_53, %c0_54] : memref<96x32xf32, #tpu.memory_space<vmem>>, vector<8x32xf32>
    tpu.vector_store %arg9[%c64_53, %c0_54], %311 {strides = array<i32>} : memref<96x32xf32, #tpu.memory_space<vmem>>, vector<8x32xf32>,
    %c72 = arith.constant 72 : index
    %c0_55 = arith.constant 0 : index
    %313 = vector.load %arg8[%c72, %c0_55] : memref<96x128xf32, #tpu.memory_space<vmem>>, vector<8x128xf32>
    %314 = arith.addf %313, %297 : vector<8x128xf32>
    %315 = math.tanh %314 : vector<8x128xf32>
    %316 = arith.mulf %315, %19 : vector<8x128xf32>
    %317 = arith.addf %316, %22 : vector<8x128xf32>
    %318 = vector.extract_strided_slice %317 {offsets = [0, 0], sizes = [8, 32], strides = [1, 1]} : vector<8x128xf32> to vector<8x32xf32>
    %319 = vector.extract_strided_slice %317 {offsets = [0, 32], sizes = [8, 32], strides = [1, 1]} : vector<8x128xf32> to vector<8x32xf32>
    %320 = vector.extract_strided_slice %317 {offsets = [0, 64], sizes = [8, 32], strides = [1, 1]} : vector<8x128xf32> to vector<8x32xf32>
    %321 = vector.extract_strided_slice %317 {offsets = [0, 96], sizes = [8, 32], strides = [1, 1]} : vector<8x128xf32> to vector<8x32xf32>
    %322 = arith.mulf %319, %292 : vector<8x32xf32>
    %323 = arith.mulf %318, %320 : vector<8x32xf32>
    %324 = arith.addf %322, %323 : vector<8x32xf32>
    %325 = math.tanh %324 : vector<8x32xf32>
    %326 = arith.mulf %321, %325 : vector<8x32xf32>
    %327 = tpu.concatenate %326, %311 in 1 : vector<8x32xf32>, vector<8x32xf32> -> vector<8x64xf32>
    %cst_56 = arith.constant dense<0.000000e+00> : vector<8x256xf32>
    %328 = tpu.matmul %327, %7, %cst_56 {dimension_numbers = #tpu.dot_dimension_numbers<[1], [0], [0], [1], [0, 0, 1, 1], [], []>} : vector<8x64xf32>, vector<64x256xf32>, vector<8x256xf32> -> vector<8x256xf32>
    %329 = vector.extract_strided_slice %328 {offsets = [0, 0], sizes = [8, 128], strides = [1, 1]} : vector<8x256xf32> to vector<8x128xf32>
    %330 = vector.extract_strided_slice %328 {offsets = [0, 128], sizes = [8, 128], strides = [1, 1]} : vector<8x256xf32> to vector<8x128xf32>
    %331 = arith.addf %330, %10 : vector<8x128xf32>
    %332 = math.tanh %331 : vector<8x128xf32>
    %333 = arith.mulf %332, %19 : vector<8x128xf32>
    %334 = arith.addf %333, %22 : vector<8x128xf32>
    %335 = vector.extract_strided_slice %334 {offsets = [0, 0], sizes = [8, 32], strides = [1, 1]} : vector<8x128xf32> to vector<8x32xf32>
    %336 = vector.extract_strided_slice %334 {offsets = [0, 32], sizes = [8, 32], strides = [1, 1]} : vector<8x128xf32> to vector<8x32xf32>
    %337 = vector.extract_strided_slice %334 {offsets = [0, 64], sizes = [8, 32], strides = [1, 1]} : vector<8x128xf32> to vector<8x32xf32>
    %338 = vector.extract_strided_slice %334 {offsets = [0, 96], sizes = [8, 32], strides = [1, 1]} : vector<8x128xf32> to vector<8x32xf32>
    %339 = arith.mulf %336, %309 : vector<8x32xf32>
    %340 = arith.mulf %335, %337 : vector<8x32xf32>
    %341 = arith.addf %339, %340 : vector<8x32xf32>
    %342 = math.tanh %341 : vector<8x32xf32>
    %343 = arith.mulf %338, %342 : vector<8x32xf32>
    %c72_57 = arith.constant 72 : index
    %c0_58 = arith.constant 0 : index
    %344 = vector.load %arg9[%c72_57, %c0_58] : memref<96x32xf32, #tpu.memory_space<vmem>>, vector<8x32xf32>
    tpu.vector_store %arg9[%c72_57, %c0_58], %343 {strides = array<i32>} : memref<96x32xf32, #tpu.memory_space<vmem>>, vector<8x32xf32>,
    %c80 = arith.constant 80 : index
    %c0_59 = arith.constant 0 : index
    %345 = vector.load %arg8[%c80, %c0_59] : memref<96x128xf32, #tpu.memory_space<vmem>>, vector<8x128xf32>
    %346 = arith.addf %345, %329 : vector<8x128xf32>
    %347 = math.tanh %346 : vector<8x128xf32>
    %348 = arith.mulf %347, %19 : vector<8x128xf32>
    %349 = arith.addf %348, %22 : vector<8x128xf32>
    %350 = vector.extract_strided_slice %349 {offsets = [0, 0], sizes = [8, 32], strides = [1, 1]} : vector<8x128xf32> to vector<8x32xf32>
    %351 = vector.extract_strided_slice %349 {offsets = [0, 32], sizes = [8, 32], strides = [1, 1]} : vector<8x128xf32> to vector<8x32xf32>
    %352 = vector.extract_strided_slice %349 {offsets = [0, 64], sizes = [8, 32], strides = [1, 1]} : vector<8x128xf32> to vector<8x32xf32>
    %353 = vector.extract_strided_slice %349 {offsets = [0, 96], sizes = [8, 32], strides = [1, 1]} : vector<8x128xf32> to vector<8x32xf32>
    %354 = arith.mulf %351, %324 : vector<8x32xf32>
    %355 = arith.mulf %350, %352 : vector<8x32xf32>
    %356 = arith.addf %354, %355 : vector<8x32xf32>
    %357 = math.tanh %356 : vector<8x32xf32>
    %358 = arith.mulf %353, %357 : vector<8x32xf32>
    %359 = tpu.concatenate %358, %343 in 1 : vector<8x32xf32>, vector<8x32xf32> -> vector<8x64xf32>
    %cst_60 = arith.constant dense<0.000000e+00> : vector<8x256xf32>
    %360 = tpu.matmul %359, %7, %cst_60 {dimension_numbers = #tpu.dot_dimension_numbers<[1], [0], [0], [1], [0, 0, 1, 1], [], []>} : vector<8x64xf32>, vector<64x256xf32>, vector<8x256xf32> -> vector<8x256xf32>
    %361 = vector.extract_strided_slice %360 {offsets = [0, 0], sizes = [8, 128], strides = [1, 1]} : vector<8x256xf32> to vector<8x128xf32>
    %362 = vector.extract_strided_slice %360 {offsets = [0, 128], sizes = [8, 128], strides = [1, 1]} : vector<8x256xf32> to vector<8x128xf32>
    %363 = arith.addf %362, %10 : vector<8x128xf32>
    %364 = math.tanh %363 : vector<8x128xf32>
    %365 = arith.mulf %364, %19 : vector<8x128xf32>
    %366 = arith.addf %365, %22 : vector<8x128xf32>
    %367 = vector.extract_strided_slice %366 {offsets = [0, 0], sizes = [8, 32], strides = [1, 1]} : vector<8x128xf32> to vector<8x32xf32>
    %368 = vector.extract_strided_slice %366 {offsets = [0, 32], sizes = [8, 32], strides = [1, 1]} : vector<8x128xf32> to vector<8x32xf32>
    %369 = vector.extract_strided_slice %366 {offsets = [0, 64], sizes = [8, 32], strides = [1, 1]} : vector<8x128xf32> to vector<8x32xf32>
    %370 = vector.extract_strided_slice %366 {offsets = [0, 96], sizes = [8, 32], strides = [1, 1]} : vector<8x128xf32> to vector<8x32xf32>
    %371 = arith.mulf %368, %341 : vector<8x32xf32>
    %372 = arith.mulf %367, %369 : vector<8x32xf32>
    %373 = arith.addf %371, %372 : vector<8x32xf32>
    %374 = math.tanh %373 : vector<8x32xf32>
    %375 = arith.mulf %370, %374 : vector<8x32xf32>
    %c80_61 = arith.constant 80 : index
    %c0_62 = arith.constant 0 : index
    %376 = vector.load %arg9[%c80_61, %c0_62] : memref<96x32xf32, #tpu.memory_space<vmem>>, vector<8x32xf32>
    tpu.vector_store %arg9[%c80_61, %c0_62], %375 {strides = array<i32>} : memref<96x32xf32, #tpu.memory_space<vmem>>, vector<8x32xf32>,
    %c88 = arith.constant 88 : index
    %c0_63 = arith.constant 0 : index
    %377 = vector.load %arg8[%c88, %c0_63] : memref<96x128xf32, #tpu.memory_space<vmem>>, vector<8x128xf32>
    %378 = arith.addf %377, %361 : vector<8x128xf32>
    %379 = math.tanh %378 : vector<8x128xf32>
    %380 = arith.mulf %379, %19 : vector<8x128xf32>
    %381 = arith.addf %380, %22 : vector<8x128xf32>
    %382 = vector.extract_strided_slice %381 {offsets = [0, 0], sizes = [8, 32], strides = [1, 1]} : vector<8x128xf32> to vector<8x32xf32>
    %383 = vector.extract_strided_slice %381 {offsets = [0, 32], sizes = [8, 32], strides = [1, 1]} : vector<8x128xf32> to vector<8x32xf32>
    %384 = vector.extract_strided_slice %381 {offsets = [0, 64], sizes = [8, 32], strides = [1, 1]} : vector<8x128xf32> to vector<8x32xf32>
    %385 = vector.extract_strided_slice %381 {offsets = [0, 96], sizes = [8, 32], strides = [1, 1]} : vector<8x128xf32> to vector<8x32xf32>
    %386 = arith.mulf %383, %356 : vector<8x32xf32>
    %387 = arith.mulf %382, %384 : vector<8x32xf32>
    %388 = arith.addf %386, %387 : vector<8x32xf32>
    %389 = math.tanh %388 : vector<8x32xf32>
    %390 = arith.mulf %385, %389 : vector<8x32xf32>
    %391 = tpu.concatenate %390, %375 in 1 : vector<8x32xf32>, vector<8x32xf32> -> vector<8x64xf32>
    %cst_64 = arith.constant dense<0.000000e+00> : vector<8x256xf32>
    %392 = tpu.matmul %391, %7, %cst_64 {dimension_numbers = #tpu.dot_dimension_numbers<[1], [0], [0], [1], [0, 0, 1, 1], [], []>} : vector<8x64xf32>, vector<64x256xf32>, vector<8x256xf32> -> vector<8x256xf32>
    %393 = vector.extract_strided_slice %392 {offsets = [0, 128], sizes = [8, 128], strides = [1, 1]} : vector<8x256xf32> to vector<8x128xf32>
    %394 = arith.addf %393, %10 : vector<8x128xf32>
    %395 = math.tanh %394 : vector<8x128xf32>
    %396 = arith.mulf %395, %19 : vector<8x128xf32>
    %397 = arith.addf %396, %22 : vector<8x128xf32>
    %398 = vector.extract_strided_slice %397 {offsets = [0, 0], sizes = [8, 32], strides = [1, 1]} : vector<8x128xf32> to vector<8x32xf32>
    %399 = vector.extract_strided_slice %397 {offsets = [0, 32], sizes = [8, 32], strides = [1, 1]} : vector<8x128xf32> to vector<8x32xf32>
    %400 = vector.extract_strided_slice %397 {offsets = [0, 64], sizes = [8, 32], strides = [1, 1]} : vector<8x128xf32> to vector<8x32xf32>
    %401 = vector.extract_strided_slice %397 {offsets = [0, 96], sizes = [8, 32], strides = [1, 1]} : vector<8x128xf32> to vector<8x32xf32>
    %402 = arith.mulf %399, %373 : vector<8x32xf32>
    %403 = arith.mulf %398, %400 : vector<8x32xf32>
    %404 = arith.addf %402, %403 : vector<8x32xf32>
    %405 = math.tanh %404 : vector<8x32xf32>
    %406 = arith.mulf %401, %405 : vector<8x32xf32>
    %c88_65 = arith.constant 88 : index
    %c0_66 = arith.constant 0 : index
    %407 = vector.load %arg9[%c88_65, %c0_66] : memref<96x32xf32, #tpu.memory_space<vmem>>, vector<8x32xf32>
    tpu.vector_store %arg9[%c88_65, %c0_66], %406 {strides = array<i32>} : memref<96x32xf32, #tpu.memory_space<vmem>>, vector<8x32xf32>,
    %c0_67 = arith.constant 0 : index
    %c0_68 = arith.constant 0 : index
    %408 = vector.load %arg9[%c0_67, %c0_68] : memref<96x32xf32, #tpu.memory_space<vmem>>, vector<96x32xf32>
    %c0_69 = arith.constant 0 : index
    %c0_70 = arith.constant 0 : index
    %409 = vector.load %arg5[%c0_69, %c0_70] : memref<32x128xf32, #tpu.memory_space<vmem>>, vector<32x128xf32>
    %cst_71 = arith.constant dense<0.000000e+00> : vector<96x128xf32>
    %410 = tpu.matmul %408, %409, %cst_71 {dimension_numbers = #tpu.dot_dimension_numbers<[1], [0], [0], [1], [0, 0, 1, 1], [], []>} : vector<96x32xf32>, vector<32x128xf32>, vector<96x128xf32> -> vector<96x128xf32>
    %c0_72 = arith.constant 0 : index
    %c0_73 = arith.constant 0 : index
    %411 = vector.load %arg6[%c0_72, %c0_73] : memref<1x128xf32, #tpu.memory_space<vmem>>, vector<1x128xf32>
    %412 = vector.broadcast %411 : vector<1x128xf32> to vector<96x128xf32>
    %413 = arith.addf %410, %412 : vector<96x128xf32>
    %cst_74 = arith.constant 0.000000e+00 : f32
    %414 = vector.broadcast %cst_74 : f32 to vector<96x128xf32>
    %415 = arith.maximumf %413, %414 : vector<96x128xf32>
    %c0_75 = arith.constant 0 : index
    %c0_76 = arith.constant 0 : index
    %416 = vector.load %arg7[%c0_75, %c0_76] : memref<96x128xf32, #tpu.memory_space<vmem>>, vector<96x128xf32>
    tpu.vector_store %arg7[%c0_75, %c0_76], %415 {strides = array<i32>} : memref<96x128xf32, #tpu.memory_space<vmem>>, vector<96x128xf32>,
    return
  }
}

</mosaic_0001>

<bundles_post_ra>
// kernel: oil_model_forward.1
= control target key start
LH: loop header
LB: loop body
LE: loop exit
PB: predicated region body
PF: predicated region fallthrough
CT: control target
= control target key end

     0   :  { %vm83_vm0 = vcmask 1042432   ;;  %vm46_vm1 = vcmask 23552   ;;  %v247_v3 = vlaneseq  ;;  %v2444_v9 = vmov 0.5   ;;  %s2446_s9 = smov 32   ;;  %s3095_s1 = inlined_call_operand.vmem [shape: f32[3,128], index: 1, kind: input, shape index: {}]   ;;  %s3096_s0 = inlined_call_operand.vmem [shape: f32[96,3], index: 0, kind: input, shape index: {}]   ;;  %s3097_s2 = inlined_call_operand.vmem [shape: f32[1,128], index: 2, kind: input, shape index: {}]   ;;  %s3098_s3 = inlined_call_operand.vmem [shape: f32[64,256], index: 3, kind: input, shape index: {}]   ;;  %s3099_s4 = inlined_call_operand.vmem [shape: f32[1,128], index: 4, kind: input, shape index: {}]   ;;  %s3100_s5 = inlined_call_operand.vmem [shape: f32[32,128], index: 5, kind: input, shape index: {}]   ;;  %s3101_s6 = inlined_call_operand.vmem [shape: f32[1,128], index: 6, kind: input, shape index: {}]   ;;  %s3102_s7 = inlined_call_operand.vmem [shape: f32[96,128], index: 7, kind: output, shape index: {}]  }
   0x1   :  { %v38_v0 = vld [vmem:[%s3095_s1] sm:$0x7]  ;;  %v27_v2 = vld [vmem:[%s3096_s0 + $0x8] sm:$0xff]  ;;  %s2445_s1 = smov 64   ;;  %v227_v21 = vld [vmem:[%s3098_s3 + $0x18] sm:$0xff]  ;;  %v2447_v45 = vmov 0.0  }
   0x2   :  { %v26_v1 = vld [vmem:[%s3096_s0] sm:$0xff]  ;;  %2092 = vmatprep.subr.msk.mxu0 %vm83_vm0, %v38_v0  ;;  %v248_v8 = vand.u32 127, %v247_v3  ;;  %v225_v20 = vld [vmem:[%s3098_s3 + $0x8] sm:$0xff]  ;;  %v226_v24 = vld [vmem:[%s3098_s3 + $0x10] sm:$0xff]  ;;  %349 = vmatprep.mubr.f32.mxu1 %v2447_v45  ;;  %vm279_vm5 = vcmask 261120   ;;  %vm281_vm6 = vcmask 523264  }
   0x3   :  { %2094 = vmatprep.mubr.msk.f32.mxu0 %vm46_vm1, %v26_v1  ;;  %2093 = vmatpush3.msk.msra.mxu0 %vm83_vm0, %v38_v0  ;;  %v2502_v4 = vld [vmem:[%s3097_s2] ss:$0 sm:$0xff]  ;;  %v2527_v23 = vpack.c.bf16 %v227_v21, %v225_v20  ;;  %v229_v25 = vld [vmem:[%s3098_s3 + $0x28] sm:$0xff]  ;;  %v231_v26 = vld [vmem:[%s3098_s3 + $0x38] sm:$0xff] }
   0x4   :  { %2095 = vmatmul.mubr.msk.f32.vlgmr.msra.gmra.mrb[0].mxu0 %vm46_vm1, %v27_v2  ;;  %vm249_vm2 = vcmp.ge.s32.totalorder %v248_v8, 64  ;;  %vm250_vm3 = vcmp.lt.s32.totalorder %v248_v8, 96  ;;  %v224_v22 = vld [vmem:[%s3098_s3] sm:$0xff]  ;;  %v2540_v28 = vpack.c.bf16 %v231_v26, %v229_v25  ;;  %v230_v30 = vld [vmem:[%s3098_s3 + $0x30] sm:$0xff]  ;;  %v233_v31 = vld [vmem:[%s3098_s3 + $0x48] sm:$0xff] }
   0x5   :  { %vm251_vm4 = vmand %vm249_vm2, %vm250_vm3  ;;  %v2538_v27 = vpack.c.bf16 %v226_v24, %v224_v22  ;;  %v228_v29 = vld [vmem:[%s3098_s3 + $0x20] sm:$0xff]  ;;  %2139 = vmatprep.subr.bf16.mxu1 %v2527_v23  ;;  %v235_v32 = vld [vmem:[%s3098_s3 + $0x58] sm:$0xff]  ;;  %2155 = vmatprep.subr.bf16.mxu0 %v2527_v23 }
   0x6   :  { %v2507_v10 = vsel %vm251_vm4, 1.0, %v2444_v9  ;;  %v2509_v12 = vsel %vm251_vm4, 0.0, %v2444_v9  ;;  %v2557_v33 = vpack.c.bf16 %v230_v30, %v228_v29  ;;  %v2561_v34 = vpack.c.bf16 %v235_v32, %v233_v31  ;;  %v232_v35 = vld [vmem:[%s3098_s3 + $0x40] sm:$0xff]  ;;  %v234_v36 = vld [vmem:[%s3098_s3 + $0x50] sm:$0xff]  ;;  %v237_v37 = vld [vmem:[%s3098_s3 + $0x68] sm:$0xff] }
   0x7   :  { %2141 = vmatpush1.bf16.msra.mxu1 %v2538_v27  ;;  %2157 = vmatpush1.bf16.msra.mxu0 %v2538_v27  ;;  %v239_v38 = vld [vmem:[%s3098_s3 + $0x78] sm:$0xff]  ;;  %v2577_v39 = vpack.c.bf16 %v234_v36, %v232_v35  ;;  %v236_v42 = vld [vmem:[%s3098_s3 + $0x60] sm:$0xff]  ;;  %v238_v43 = vld [vmem:[%s3098_s3 + $0x70] sm:$0xff] }
   0x8   :  { %2143 = vmatprep.subr.bf16.mxu1 %v2540_v28  ;;  %2159 = vmatprep.subr.bf16.mxu0 %v2540_v28  ;;  %v2581_v41 = vpack.c.bf16 %v239_v38, %v237_v37  ;;  %v2592_v44 = vpack.c.bf16 %v238_v43, %v236_v42  ;;  %v2619_v51 = vld [vmem:[%s3099_s4] ss:$0 sm:$0xff]  ;;  %v28_v9 = vld [vmem:[%s3096_s0 + $0x10] sm:$0xff]  ;;  %v35_v20 = vld [vmem:[%s3096_s0 + $0x48] sm:$0xff] }
   0x9   :  { %2097 = vmatprep.mubr.msk.f32.mxu0 %vm46_vm1, %v28_v9  ;;  %v36_v21 = vld [vmem:[%s3096_s0 + $0x50] sm:$0xff]  ;;  %v37_v22 = vld [vmem:[%s3096_s0 + $0x58] sm:$0xff] }
   0xb   :  { %2145 = vmatpush1.bf16.msra.mxu1 %v2557_v33  ;;  %2161 = vmatpush1.bf16.msra.mxu0 %v2557_v33 }
   0xc   :  { %2147 = vmatprep.subr.bf16.mxu1 %v2561_v34  ;;  %2163 = vmatprep.subr.bf16.mxu0 %v2561_v34 }
   0xf   :  { %2149 = vmatpush1.bf16.msra.mxu1 %v2577_v39  ;;  %2165 = vmatpush1.bf16.msra.mxu0 %v2577_v39 }
  0x10   :  { %2151 = vmatprep.subr.bf16.mxu1 %v2581_v41  ;;  %2167 = vmatprep.subr.bf16.mxu0 %v2581_v41 }
  0x13   :  { %2153 = vmatpush1.bf16.msra.mxu1 %v2592_v44  ;;  %2169 = vmatpush1.bf16.msra.mxu0 %v2592_v44 }
  0x14   :  { %2171 = vmatprep.subr.bf16.mxu1 %v2527_v23  ;;  %2187 = vmatprep.subr.bf16.mxu0 %v2527_v23 }
  0xd7   :  { %v2504_v5 = vpop.f32.mrb[0].mxu0 }
  0xd8   :  { %v153_v6 = vpop.f32.mrb[1].mxu0  ;;  %v159_v50 = vadd.f32 %v2504_v5, %v2502_v4 }
  0xd9   :  { %v154_v7 = vadd.f32 %v2502_v4, %v153_v6 }
  0xdb   :  { %2346 = vtanh.f32 %v154_v7 }
  0xe5   :  { %v2347_v11 = vpop.eup %2346 }
  0xe6   :  { %v256_v13 = vmul.f32 %v2347_v11, %v2507_v10  ;;  %v29_v11 = vld [vmem:[%s3096_s0 + $0x18] sm:$0xff] }
  0xe7   :  { %2098 = vmatmul.mubr.msk.f32.gmra.mrb[2].mxu0 %vm46_vm1, %v29_v11 }
  0xe8   :  { %v257_v14 = vadd.f32 %v256_v13, %v2509_v12  ;;  %v30_v13 = vld [vmem:[%s3096_s0 + $0x20] sm:$0xff] }
  0xe9   :  { %2100 = vmatprep.mubr.msk.f32.mxu0 %vm46_vm1, %v30_v13 }
  0xea   :  { %260 = vrot.lane.b32.xlu0 %v257_v14, %s2445_s1  ;;  %v258_v17 = vmul.f32 0.0, %v257_v14 }
 0x15c   :  { %v261_v15 = vpop.permute.xlu0 %260 }
 0x15d   :  { %v263_v16 = vmul.f32 %v261_v15, %v257_v14  ;;  %v32_v15 = vld [vmem:[%s3096_s0 + $0x30] sm:$0xff] }
 0x15f   :  { %265 = vrot.lane.b32.xlu0 %v263_v16, %s2446_s9  ;;  %v33_v16 = vld [vmem:[%s3096_s0 + $0x38] sm:$0xff] }
 0x1ba   :  { %v2685_v30 = vpop.f32.mrb[2].mxu0 }
 0x1bb   :  { %v163_v31 = vpop.f32.mrb[3].mxu0 }
 0x1d1   :  { %v266_v18 = vpop.permute.xlu0 %265 }
 0x1d2   :  { %v2515_v19 = vadd.f32 %v266_v18, %v258_v17  ;;  %v34_v17 = vld [vmem:[%s3096_s0 + $0x40] sm:$0xff] }
 0x1d4   :  { %2348 = vtanh.f32 %v2515_v19 }
 0x1de   :  { %v2349_v40 = vpop.eup %2348 }
 0x1df   :  { %271 = vrot.lane.b32.xlu1 %v2349_v40, %s2445_s1 }
 0x251   :  { %v272_v46 = vpop.permute.xlu1 %271 }
 0x252   :  { %v274_v47 = vmul.f32 %v272_v46, %v257_v14  ;;  %v31_v14 = vld [vmem:[%s3096_s0 + $0x28] sm:$0xff] }
 0x253   :  { %2101 = vmatmul.mubr.msk.f32.gmra.mrb[4].mxu0 %vm46_vm1, %v31_v14 }
 0x254   :  { %276 = vrot.lane.b32.xlu1 %v274_v47, %s2446_s9  ;;  %2103 = vmatprep.mubr.msk.f32.mxu0 %vm46_vm1, %v32_v15 }
 0x257   :  { %2104 = vmatmul.mubr.msk.f32.gmra.mrb[6].mxu0 %vm46_vm1, %v33_v16 }
 0x258   :  { %2106 = vmatprep.mubr.msk.f32.mxu0 %vm46_vm1, %v34_v17 }
 0x25b   :  { %2107 = vmatmul.mubr.msk.f32.gmra.mrb[8].mxu0 %vm46_vm1, %v35_v20 }
 0x25c   :  { %2109 = vmatprep.mubr.msk.f32.mxu0 %vm46_vm1, %v36_v21 }
 0x25f   :  { %2110 = vmatmul.mubr.msk.f32.gmra.mrb[10].mxu0 %vm46_vm1, %v37_v22 }
 0x260   :  { %479 = vmatprep.mubr.f32.mxu0 %v2447_v45 }
 0x2c6   :  { %v277_v48 = vpop.permute.xlu1 %276 }
 0x2c7   :  { %v280_v49 = vsel %vm279_vm5, %v277_v48, 0.0 }
 0x2c8   :  { %2038 = vmatmul.mubr.msk.f32.vlgmr.msra.gmra.mrb[0].mxu1 %vm281_vm6, %v280_v49  ;;  %v164_v49 = vadd.f32 %v2502_v4, %v163_v31 }
 0x2c9   :  { %2173 = vmatpush1.bf16.msra.mxu1 %v2538_v27  ;;  %609 = vmatprep.mubr.f32.mxu1 %v2447_v45 }
 0x2ca   :  { %2175 = vmatprep.subr.bf16.mxu1 %v2540_v28 }
 0x2cd   :  { %2177 = vmatpush1.bf16.msra.mxu1 %v2557_v33 }
 0x2ce   :  { %2179 = vmatprep.subr.bf16.mxu1 %v2561_v34 }
 0x2d1   :  { %2181 = vmatpush1.bf16.msra.mxu1 %v2577_v39 }
 0x2d2   :  { %2183 = vmatprep.subr.bf16.mxu1 %v2581_v41 }
 0x2d5   :  { %2185 = vmatpush1.bf16.msra.mxu1 %v2592_v44 }
 0x2d6   :  { %2203 = vmatprep.subr.bf16.mxu1 %v2527_v23 }
 0x326   :  { %v2687_v32 = vpop.f32.mrb[4].mxu0 }
 0x327   :  { %v2689_v35 = vpop.f32.mrb[5].mxu0 }
 0x32a   :  { %v2691_v36 = vpop.f32.mrb[6].mxu0 }
 0x32b   :  { %v2693_v37 = vpop.f32.mrb[7].mxu0 }
 0x32e   :  { %v2695_v38 = vpop.f32.mrb[8].mxu0 }
 0x32f   :  { %v2697_v40 = vpop.f32.mrb[9].mxu0 }
 0x332   :  { %v2699_v42 = vpop.f32.mrb[10].mxu0 }
 0x333   :  { %v2701_v43 = vpop.f32.mrb[11].mxu0 }
 0x39b   :  { %v351_v52 = vpop.f32.mrb[0].mxu1 }
 0x39c   :  { %v383_v53 = vadd.f32 %v351_v52, %v159_v50  ;;  %v353_v54 = vpop.f32.mrb[1].mxu1 }
 0x39d   :  { %v356_v55 = vadd.f32 %v2619_v51, %v353_v54 }
 0x39e   :  { %2350 = vtanh.f32 %v383_v53 }
 0x39f   :  { %2352 = vtanh.f32 %v356_v55 }
 0x3a8   :  { %v2351_v56 = vpop.eup %2350 }
 0x3a9   :  { %v2353_v57 = vpop.eup %2352  ;;  %v385_v58 = vmul.f32 %v2351_v56, %v2507_v10 }
 0x3aa   :  { %v358_v59 = vmul.f32 %v2353_v57, %v2507_v10 }
 0x3ab   :  { %v386_v60 = vadd.f32 %v385_v58, %v2509_v12 }
 0x3ac   :  { %v359_v61 = vadd.f32 %v358_v59, %v2509_v12 }
 0x3ad   :  { %389 = vrot.lane.b32.xlu1 %v386_v60, %s2445_s1  ;;  %v387_v2 = vmul.f32 %v386_v60, %v2515_v19 }
 0x3ae   :  { %362 = vrot.lane.b32.xlu0 %v359_v61, %s2445_s1  ;;  %v360_v5 = vmul.f32 0.0, %v359_v61 }
 0x41f   :  { %v390_v62 = vpop.permute.xlu1 %389 }
 0x420   :  { %v392_v63 = vmul.f32 %v390_v62, %v386_v60  ;;  %v363_v0 = vpop.permute.xlu0 %362 }
 0x421   :  { %v365_v1 = vmul.f32 %v363_v0, %v359_v61 }
 0x422   :  { %394 = vrot.lane.b32.xlu1 %v392_v63, %s2446_s9 }
 0x423   :  { %367 = vrot.lane.b32.xlu0 %v365_v1, %s2446_s9 }
 0x494   :  { %v395_v3 = vpop.permute.xlu1 %394 }
 0x495   :  { %v2631_v6 = vadd.f32 %v395_v3, %v387_v2  ;;  %v368_v7 = vpop.permute.xlu0 %367 }
 0x496   :  { %v2633_v8 = vadd.f32 %v368_v7, %v360_v5 }
 0x497   :  { %2354 = vtanh.f32 %v2631_v6 }
 0x498   :  { %2356 = vtanh.f32 %v2633_v8 }
 0x4a1   :  { %v2355_v18 = vpop.eup %2354 }
 0x4a2   :  { %v2357_v19 = vpop.eup %2356  ;;  %400 = vrot.lane.b32.xlu1 %v2355_v18, %s2445_s1 }
 0x4a3   :  { %373 = vrot.lane.b32.xlu0 %v2357_v19, %s2445_s1  ;;  %v169_v19 = vadd.f32 %v2685_v30, %v2502_v4 }
 0x514   :  { %v401_v24 = vpop.permute.xlu1 %400 }
 0x515   :  { %v403_v25 = vmul.f32 %v401_v24, %v386_v60  ;;  %v374_v26 = vpop.permute.xlu0 %373 }
 0x516   :  { %v2680_v29 = vmul.f32 %v374_v26, %v359_v61 }
 0x517   :  { %405 = vrot.lane.b32.xlu0 %v403_v25, %s2446_s9 }
 0x518   :  { %408 = vrot.lane.b32.xlu1 %v2680_v29, %s2445_s1 }
 0x589   :  { %v406_v46 = vpop.permute.xlu0 %405 }
 0x58a   :  { %v409_v47 = vpop.permute.xlu1 %408 }
 0x58b   :  { %v411_v48 = vsel %vm279_vm5, %v406_v46, %v409_v47 }
 0x58c   :  { %2039 = vmatmul.mubr.msk.f32.vlgmr.msra.gmra.mrb[12].mxu0 %vm281_vm6, %v411_v48 }
 0x58d   :  { %2189 = vmatpush1.bf16.msra.mxu0 %v2538_v27  ;;  %739 = vmatprep.mubr.f32.mxu0 %v2447_v45 }
 0x58e   :  { %2191 = vmatprep.subr.bf16.mxu0 %v2540_v28 }
 0x591   :  { %2193 = vmatpush1.bf16.msra.mxu0 %v2557_v33 }
 0x592   :  { %2195 = vmatprep.subr.bf16.mxu0 %v2561_v34 }
 0x595   :  { %2197 = vmatpush1.bf16.msra.mxu0 %v2577_v39 }
 0x596   :  { %2199 = vmatprep.subr.bf16.mxu0 %v2581_v41 }
 0x599   :  { %2201 = vmatpush1.bf16.msra.mxu0 %v2592_v44 }
 0x59a   :  { %2219 = vmatprep.subr.bf16.mxu0 %v2527_v23 }
 0x65f   :  { %v481_v50 = vpop.f32.mrb[12].mxu0 }
 0x660   :  { %v513_v52 = vadd.f32 %v481_v50, %v164_v49  ;;  %v483_v53 = vpop.f32.mrb[13].mxu0 }
 0x661   :  { %v486_v54 = vadd.f32 %v2619_v51, %v483_v53 }
 0x662   :  { %2358 = vtanh.f32 %v513_v52 }
 0x663   :  { %2360 = vtanh.f32 %v486_v54 }
 0x66c   :  { %v2359_v55 = vpop.eup %2358 }
 0x66d   :  { %v2361_v56 = vpop.eup %2360  ;;  %v515_v57 = vmul.f32 %v2359_v55, %v2507_v10 }
 0x66e   :  { %v488_v58 = vmul.f32 %v2361_v56, %v2507_v10 }
 0x66f   :  { %v516_v59 = vadd.f32 %v515_v57, %v2509_v12 }
 0x670   :  { %v489_v60 = vadd.f32 %v488_v58, %v2509_v12 }
 0x671   :  { %519 = vrot.lane.b32.xlu1 %v516_v59, %s2445_s1  ;;  %v517_v1 = vmul.f32 %v516_v59, %v2631_v6 }
 0x672   :  { %492 = vrot.lane.b32.xlu0 %v489_v60, %s2445_s1  ;;  %v490_v3 = vmul.f32 %v489_v60, %v2633_v8 }
 0x6e3   :  { %v520_v61 = vpop.permute.xlu1 %519 }
 0x6e4   :  { %v522_v62 = vmul.f32 %v520_v61, %v516_v59  ;;  %v493_v63 = vpop.permute.xlu0 %492 }
 0x6e5   :  { %v495_v0 = vmul.f32 %v493_v63, %v489_v60 }
 0x6e6   :  { %524 = vrot.lane.b32.xlu1 %v522_v62, %s2446_s9 }
 0x6e7   :  { %497 = vrot.lane.b32.xlu0 %v495_v0, %s2446_s9 }
 0x758   :  { %v525_v2 = vpop.permute.xlu1 %524 }
 0x759   :  { %v527_v5 = vadd.f32 %v525_v2, %v517_v1  ;;  %v498_v7 = vpop.permute.xlu0 %497 }
 0x75a   :  { %v500_v9 = vadd.f32 %v498_v7, %v490_v3 }
 0x75b   :  { %2362 = vtanh.f32 %v527_v5 }
 0x75c   :  { %2364 = vtanh.f32 %v500_v9 }
 0x765   :  { %v2363_v11 = vpop.eup %2362 }
 0x766   :  { %v2365_v13 = vpop.eup %2364  ;;  %530 = vrot.lane.b32.xlu1 %v2363_v11, %s2445_s1 }
 0x767   :  { %503 = vrot.lane.b32.xlu0 %v2365_v13, %s2445_s1 }
 0x7d8   :  { %v531_v14 = vpop.permute.xlu1 %530 }
 0x7d9   :  { %v533_v15 = vmul.f32 %v531_v14, %v516_v59  ;;  %v504_v16 = vpop.permute.xlu0 %503 }
 0x7da   :  { %v2728_v17 = vmul.f32 %v504_v16, %v489_v60 }
 0x7db   :  { %535 = vrot.lane.b32.xlu0 %v533_v15, %s2446_s9 }
 0x7dc   :  { %538 = vrot.lane.b32.xlu1 %v2728_v17, %s2445_s1 }
 0x84d   :  { %v536_v6 = vpop.permute.xlu0 %535 }
 0x84e   :  { %v539_v8 = vpop.permute.xlu1 %538 }
 0x84f   :  { %v541_v18 = vsel %vm279_vm5, %v536_v6, %v539_v8 }
 0x850   :  { %2040 = vmatmul.mubr.msk.f32.vlgmr.msra.gmra.mrb[2].mxu1 %vm281_vm6, %v541_v18 }
 0x851   :  { %2205 = vmatpush1.bf16.msra.mxu1 %v2538_v27  ;;  %869 = vmatprep.mubr.f32.mxu1 %v2447_v45 }
 0x852   :  { %2207 = vmatprep.subr.bf16.mxu1 %v2540_v28 }
 0x855   :  { %2209 = vmatpush1.bf16.msra.mxu1 %v2557_v33 }
 0x856   :  { %2211 = vmatprep.subr.bf16.mxu1 %v2561_v34 }
 0x859   :  { %2213 = vmatpush1.bf16.msra.mxu1 %v2577_v39 }
 0x85a   :  { %2215 = vmatprep.subr.bf16.mxu1 %v2581_v41 }
 0x85d   :  { %2217 = vmatpush1.bf16.msra.mxu1 %v2592_v44 }
 0x85e   :  { %2235 = vmatprep.subr.bf16.mxu1 %v2527_v23 }
 0x923   :  { %v611_v20 = vpop.f32.mrb[2].mxu1 }
 0x924   :  { %v643_v21 = vadd.f32 %v611_v20, %v169_v19  ;;  %v613_v22 = vpop.f32.mrb[3].mxu1 }
 0x925   :  { %v616_v24 = vadd.f32 %v2619_v51, %v613_v22 }
 0x926   :  { %2366 = vtanh.f32 %v643_v21 }
 0x927   :  { %2368 = vtanh.f32 %v616_v24 }
 0x930   :  { %v2367_v25 = vpop.eup %2366 }
 0x931   :  { %v2369_v26 = vpop.eup %2368  ;;  %v645_v31 = vmul.f32 %v2367_v25, %v2507_v10 }
 0x932   :  { %v618_v46 = vmul.f32 %v2369_v26, %v2507_v10 }
 0x933   :  { %v646_v47 = vadd.f32 %v645_v31, %v2509_v12 }
 0x934   :  { %v619_v48 = vadd.f32 %v618_v46, %v2509_v12 }
 0x935   :  { %649 = vrot.lane.b32.xlu1 %v646_v47, %s2445_s1  ;;  %v647_v53 = vmul.f32 %v646_v47, %v527_v5  ;;  %v174_v5 = vadd.f32 %v2502_v4, %v2689_v35 }
 0x936   :  { %622 = vrot.lane.b32.xlu0 %v619_v48, %s2445_s1  ;;  %v620_v55 = vmul.f32 %v619_v48, %v500_v9 }
 0x9a7   :  { %v650_v30 = vpop.permute.xlu1 %649 }
 0x9a8   :  { %v652_v49 = vmul.f32 %v650_v30, %v646_v47  ;;  %v623_v50 = vpop.permute.xlu0 %622 }
 0x9a9   :  { %v625_v52 = vmul.f32 %v623_v50, %v619_v48 }
 0x9aa   :  { %654 = vrot.lane.b32.xlu1 %v652_v49, %s2446_s9 }
 0x9ab   :  { %627 = vrot.lane.b32.xlu0 %v625_v52, %s2446_s9 }
 0xa1c   :  { %v655_v54 = vpop.permute.xlu1 %654 }
 0xa1d   :  { %v657_v56 = vadd.f32 %v655_v54, %v647_v53  ;;  %v628_v57 = vpop.permute.xlu0 %627 }
 0xa1e   :  { %v630_v58 = vadd.f32 %v628_v57, %v620_v55 }
 0xa1f   :  { %2370 = vtanh.f32 %v657_v56 }
 0xa20   :  { %2372 = vtanh.f32 %v630_v58 }
 0xa29   :  { %v2371_v59 = vpop.eup %2370 }
 0xa2a   :  { %v2373_v60 = vpop.eup %2372  ;;  %660 = vrot.lane.b32.xlu1 %v2371_v59, %s2445_s1 }
 0xa2b   :  { %633 = vrot.lane.b32.xlu0 %v2373_v60, %s2445_s1 }
 0xa9c   :  { %v661_v61 = vpop.permute.xlu1 %660 }
 0xa9d   :  { %v663_v62 = vmul.f32 %v661_v61, %v646_v47  ;;  %v634_v63 = vpop.permute.xlu0 %633 }
 0xa9e   :  { %v2757_v0 = vmul.f32 %v634_v63, %v619_v48 }
 0xa9f   :  { %665 = vrot.lane.b32.xlu0 %v663_v62, %s2446_s9 }
 0xaa0   :  { %668 = vrot.lane.b32.xlu1 %v2757_v0, %s2445_s1 }
 0xb11   :  { %v666_v1 = vpop.permute.xlu0 %665 }
 0xb12   :  { %v669_v2 = vpop.permute.xlu1 %668 }
 0xb13   :  { %v671_v3 = vsel %vm279_vm5, %v666_v1, %v669_v2 }
 0xb14   :  { %2041 = vmatmul.mubr.msk.f32.vlgmr.msra.gmra.mrb[14].mxu0 %vm281_vm6, %v671_v3 }
 0xb15   :  { %2221 = vmatpush1.bf16.msra.mxu0 %v2538_v27  ;;  %999 = vmatprep.mubr.f32.mxu0 %v2447_v45 }
 0xb16   :  { %2223 = vmatprep.subr.bf16.mxu0 %v2540_v28 }
 0xb19   :  { %2225 = vmatpush1.bf16.msra.mxu0 %v2557_v33 }
 0xb1a   :  { %2227 = vmatprep.subr.bf16.mxu0 %v2561_v34 }
 0xb1d   :  { %2229 = vmatpush1.bf16.msra.mxu0 %v2577_v39 }
 0xb1e   :  { %2231 = vmatprep.subr.bf16.mxu0 %v2581_v41 }
 0xb21   :  { %2233 = vmatpush1.bf16.msra.mxu0 %v2592_v44 }
 0xb22   :  { %2251 = vmatprep.subr.bf16.mxu0 %v2527_v23 }
 0xbe7   :  { %v741_v7 = vpop.f32.mrb[14].mxu0 }
 0xbe8   :  { %v773_v9 = vadd.f32 %v741_v7, %v174_v5  ;;  %v743_v11 = vpop.f32.mrb[15].mxu0 }
 0xbe9   :  { %v746_v13 = vadd.f32 %v2619_v51, %v743_v11 }
 0xbea   :  { %2374 = vtanh.f32 %v773_v9 }
 0xbeb   :  { %2376 = vtanh.f32 %v746_v13 }
 0xbf4   :  { %v2375_v14 = vpop.eup %2374 }
 0xbf5   :  { %v2377_v15 = vpop.eup %2376  ;;  %v775_v16 = vmul.f32 %v2375_v14, %v2507_v10 }
 0xbf6   :  { %v748_v6 = vmul.f32 %v2377_v15, %v2507_v10 }
 0xbf7   :  { %v776_v8 = vadd.f32 %v775_v16, %v2509_v12 }
 0xbf8   :  { %v749_v18 = vadd.f32 %v748_v6, %v2509_v12 }
 0xbf9   :  { %779 = vrot.lane.b32.xlu1 %v776_v8, %s2445_s1  ;;  %v777_v22 = vmul.f32 %v776_v8, %v657_v56  ;;  %v179_v56 = vadd.f32 %v2687_v32, %v2502_v4 }
 0xbfa   :  { %752 = vrot.lane.b32.xlu0 %v749_v18, %s2445_s1  ;;  %v750_v25 = vmul.f32 %v749_v18, %v630_v58 }
 0xc6b   :  { %v780_v35 = vpop.permute.xlu1 %779 }
 0xc6c   :  { %v782_v19 = vmul.f32 %v780_v35, %v776_v8  ;;  %v753_v20 = vpop.permute.xlu0 %752 }
 0xc6d   :  { %v755_v21 = vmul.f32 %v753_v20, %v749_v18 }
 0xc6e   :  { %784 = vrot.lane.b32.xlu1 %v782_v19, %s2446_s9 }
 0xc6f   :  { %757 = vrot.lane.b32.xlu0 %v755_v21, %s2446_s9 }
 0xce0   :  { %v785_v24 = vpop.permute.xlu1 %784 }
 0xce1   :  { %v787_v26 = vadd.f32 %v785_v24, %v777_v22  ;;  %v758_v31 = vpop.permute.xlu0 %757 }
 0xce2   :  { %v760_v46 = vadd.f32 %v758_v31, %v750_v25 }
 0xce3   :  { %2378 = vtanh.f32 %v787_v26 }
 0xce4   :  { %2380 = vtanh.f32 %v760_v46 }
 0xced   :  { %v2379_v47 = vpop.eup %2378 }
 0xcee   :  { %v2381_v48 = vpop.eup %2380  ;;  %790 = vrot.lane.b32.xlu1 %v2379_v47, %s2445_s1 }
 0xcef   :  { %763 = vrot.lane.b32.xlu0 %v2381_v48, %s2445_s1 }
 0xd60   :  { %v791_v30 = vpop.permute.xlu1 %790 }
 0xd61   :  { %v793_v49 = vmul.f32 %v791_v30, %v776_v8  ;;  %v764_v50 = vpop.permute.xlu0 %763 }
 0xd62   :  { %v2786_v52 = vmul.f32 %v764_v50, %v749_v18 }
 0xd63   :  { %795 = vrot.lane.b32.xlu0 %v793_v49, %s2446_s9 }
 0xd64   :  { %798 = vrot.lane.b32.xlu1 %v2786_v52, %s2445_s1 }
 0xdd5   :  { %v796_v53 = vpop.permute.xlu0 %795 }
 0xdd6   :  { %v799_v54 = vpop.permute.xlu1 %798 }
 0xdd7   :  { %v801_v55 = vsel %vm279_vm5, %v796_v53, %v799_v54 }
 0xdd8   :  { %2042 = vmatmul.mubr.msk.f32.vlgmr.msra.gmra.mrb[4].mxu1 %vm281_vm6, %v801_v55 }
 0xdd9   :  { %2237 = vmatpush1.bf16.msra.mxu1 %v2538_v27  ;;  %1129 = vmatprep.mubr.f32.mxu1 %v2447_v45 }
 0xdda   :  { %2239 = vmatprep.subr.bf16.mxu1 %v2540_v28 }
 0xddd   :  { %2241 = vmatpush1.bf16.msra.mxu1 %v2557_v33 }
 0xdde   :  { %2243 = vmatprep.subr.bf16.mxu1 %v2561_v34 }
 0xde1   :  { %2245 = vmatpush1.bf16.msra.mxu1 %v2577_v39 }
 0xde2   :  { %2247 = vmatprep.subr.bf16.mxu1 %v2581_v41 }
 0xde5   :  { %2249 = vmatpush1.bf16.msra.mxu1 %v2592_v44 }
 0xde6   :  { %2267 = vmatprep.subr.bf16.mxu1 %v2527_v23 }
 0xeab   :  { %v871_v57 = vpop.f32.mrb[4].mxu1 }
 0xeac   :  { %v903_v58 = vadd.f32 %v871_v57, %v179_v56  ;;  %v873_v59 = vpop.f32.mrb[5].mxu1 }
 0xead   :  { %v876_v60 = vadd.f32 %v2619_v51, %v873_v59 }
 0xeae   :  { %2382 = vtanh.f32 %v903_v58 }
 0xeaf   :  { %2384 = vtanh.f32 %v876_v60 }
 0xeb8   :  { %v2383_v61 = vpop.eup %2382 }
 0xeb9   :  { %v2385_v62 = vpop.eup %2384  ;;  %v905_v63 = vmul.f32 %v2383_v61, %v2507_v10 }
 0xeba   :  { %v878_v1 = vmul.f32 %v2385_v62, %v2507_v10 }
 0xebb   :  { %v906_v2 = vadd.f32 %v905_v63, %v2509_v12 }
 0xebc   :  { %v879_v3 = vadd.f32 %v878_v1, %v2509_v12 }
 0xebd   :  { %909 = vrot.lane.b32.xlu1 %v906_v2, %s2445_s1  ;;  %v907_v11 = vmul.f32 %v906_v2, %v787_v26  ;;  %v184_v26 = vadd.f32 %v2502_v4, %v2693_v37 }
 0xebe   :  { %882 = vrot.lane.b32.xlu0 %v879_v3, %s2445_s1  ;;  %v880_v14 = vmul.f32 %v879_v3, %v760_v46 }
 0xf2f   :  { %v910_v32 = vpop.permute.xlu1 %909 }
 0xf30   :  { %v912_v5 = vmul.f32 %v910_v32, %v906_v2  ;;  %v883_v7 = vpop.permute.xlu0 %882 }
 0xf31   :  { %v885_v9 = vmul.f32 %v883_v7, %v879_v3 }
 0xf32   :  { %914 = vrot.lane.b32.xlu1 %v912_v5, %s2446_s9 }
 0xf33   :  { %887 = vrot.lane.b32.xlu0 %v885_v9, %s2446_s9 }
 0xfa4   :  { %v915_v13 = vpop.permute.xlu1 %914 }
 0xfa5   :  { %v917_v15 = vadd.f32 %v915_v13, %v907_v11  ;;  %v888_v16 = vpop.permute.xlu0 %887 }
 0xfa6   :  { %v890_v6 = vadd.f32 %v888_v16, %v880_v14 }
 0xfa7   :  { %2386 = vtanh.f32 %v917_v15 }
 0xfa8   :  { %2388 = vtanh.f32 %v890_v6 }
 0xfb1   :  { %v2387_v8 = vpop.eup %2386 }
 0xfb2   :  { %v2389_v18 = vpop.eup %2388  ;;  %920 = vrot.lane.b32.xlu1 %v2387_v8, %s2445_s1 }
 0xfb3   :  { %893 = vrot.lane.b32.xlu0 %v2389_v18, %s2445_s1 }
0x1024   :  { %v921_v35 = vpop.permute.xlu1 %920 }
0x1025   :  { %v923_v19 = vmul.f32 %v921_v35, %v906_v2  ;;  %v894_v20 = vpop.permute.xlu0 %893 }
0x1026   :  { %v2815_v21 = vmul.f32 %v894_v20, %v879_v3 }
0x1027   :  { %925 = vrot.lane.b32.xlu0 %v923_v19, %s2446_s9 }
0x1028   :  { %928 = vrot.lane.b32.xlu1 %v2815_v21, %s2445_s1 }
0x1099   :  { %v926_v22 = vpop.permute.xlu0 %925 }
0x109a   :  { %v929_v24 = vpop.permute.xlu1 %928 }
0x109b   :  { %v931_v25 = vsel %vm279_vm5, %v926_v22, %v929_v24 }
0x109c   :  { %2043 = vmatmul.mubr.msk.f32.vlgmr.msra.gmra.mrb[16].mxu0 %vm281_vm6, %v931_v25 }
0x109d   :  { %2253 = vmatpush1.bf16.msra.mxu0 %v2538_v27  ;;  %1259 = vmatprep.mubr.f32.mxu0 %v2447_v45 }
0x109e   :  { %2255 = vmatprep.subr.bf16.mxu0 %v2540_v28 }
0x10a1   :  { %2257 = vmatpush1.bf16.msra.mxu0 %v2557_v33 }
0x10a2   :  { %2259 = vmatprep.subr.bf16.mxu0 %v2561_v34 }
0x10a5   :  { %2261 = vmatpush1.bf16.msra.mxu0 %v2577_v39 }
0x10a6   :  { %2263 = vmatprep.subr.bf16.mxu0 %v2581_v41 }
0x10a9   :  { %2265 = vmatpush1.bf16.msra.mxu0 %v2592_v44 }
0x10aa   :  { %2283 = vmatprep.subr.bf16.mxu0 %v2527_v23 }
0x116f   :  { %v1001_v31 = vpop.f32.mrb[16].mxu0 }
0x1170   :  { %v1033_v46 = vadd.f32 %v1001_v31, %v184_v26  ;;  %v1003_v47 = vpop.f32.mrb[17].mxu0 }
0x1171   :  { %v1006_v48 = vadd.f32 %v2619_v51, %v1003_v47 }
0x1172   :  { %2390 = vtanh.f32 %v1033_v46 }
0x1173   :  { %2392 = vtanh.f32 %v1006_v48 }
0x117c   :  { %v2391_v30 = vpop.eup %2390 }
0x117d   :  { %v2393_v49 = vpop.eup %2392  ;;  %v1035_v50 = vmul.f32 %v2391_v30, %v2507_v10 }
0x117e   :  { %v1008_v53 = vmul.f32 %v2393_v49, %v2507_v10 }
0x117f   :  { %v1036_v54 = vadd.f32 %v1035_v50, %v2509_v12 }
0x1180   :  { %v1009_v55 = vadd.f32 %v1008_v53, %v2509_v12 }
0x1181   :  { %1039 = vrot.lane.b32.xlu1 %v1036_v54, %s2445_s1  ;;  %v1037_v59 = vmul.f32 %v1036_v54, %v917_v15  ;;  %v189_v15 = vadd.f32 %v2691_v36, %v2502_v4 }
0x1182   :  { %1012 = vrot.lane.b32.xlu0 %v1009_v55, %s2445_s1  ;;  %v1010_v61 = vmul.f32 %v1009_v55, %v890_v6 }
0x11f3   :  { %v1040_v37 = vpop.permute.xlu1 %1039 }
0x11f4   :  { %v1042_v56 = vmul.f32 %v1040_v37, %v1036_v54  ;;  %v1013_v57 = vpop.permute.xlu0 %1012 }
0x11f5   :  { %v1015_v58 = vmul.f32 %v1013_v57, %v1009_v55 }
0x11f6   :  { %1044 = vrot.lane.b32.xlu1 %v1042_v56, %s2446_s9 }
0x11f7   :  { %1017 = vrot.lane.b32.xlu0 %v1015_v58, %s2446_s9 }
0x1268   :  { %v1045_v60 = vpop.permute.xlu1 %1044 }
0x1269   :  { %v1047_v62 = vadd.f32 %v1045_v60, %v1037_v59  ;;  %v1018_v63 = vpop.permute.xlu0 %1017 }
0x126a   :  { %v1020_v1 = vadd.f32 %v1018_v63, %v1010_v61 }
0x126b   :  { %2394 = vtanh.f32 %v1047_v62 }
0x126c   :  { %2396 = vtanh.f32 %v1020_v1 }
0x1275   :  { %v2395_v2 = vpop.eup %2394 }
0x1276   :  { %v2397_v3 = vpop.eup %2396  ;;  %1050 = vrot.lane.b32.xlu1 %v2395_v2, %s2445_s1 }
0x1277   :  { %1023 = vrot.lane.b32.xlu0 %v2397_v3, %s2445_s1 }
0x12e8   :  { %v1051_v32 = vpop.permute.xlu1 %1050 }
0x12e9   :  { %v1053_v5 = vmul.f32 %v1051_v32, %v1036_v54  ;;  %v1024_v7 = vpop.permute.xlu0 %1023 }
0x12ea   :  { %v2844_v9 = vmul.f32 %v1024_v7, %v1009_v55 }
0x12eb   :  { %1055 = vrot.lane.b32.xlu0 %v1053_v5, %s2446_s9 }
0x12ec   :  { %1058 = vrot.lane.b32.xlu1 %v2844_v9, %s2445_s1 }
0x135d   :  { %v1056_v11 = vpop.permute.xlu0 %1055 }
0x135e   :  { %v1059_v13 = vpop.permute.xlu1 %1058 }
0x135f   :  { %v1061_v14 = vsel %vm279_vm5, %v1056_v11, %v1059_v13 }
0x1360   :  { %2044 = vmatmul.mubr.msk.f32.vlgmr.msra.gmra.mrb[6].mxu1 %vm281_vm6, %v1061_v14 }
0x1361   :  { %2269 = vmatpush1.bf16.msra.mxu1 %v2538_v27  ;;  %1389 = vmatprep.mubr.f32.mxu1 %v2447_v45 }
0x1362   :  { %2271 = vmatprep.subr.bf16.mxu1 %v2540_v28 }
0x1365   :  { %2273 = vmatpush1.bf16.msra.mxu1 %v2557_v33 }
0x1366   :  { %2275 = vmatprep.subr.bf16.mxu1 %v2561_v34 }
0x1369   :  { %2277 = vmatpush1.bf16.msra.mxu1 %v2577_v39 }
0x136a   :  { %2279 = vmatprep.subr.bf16.mxu1 %v2581_v41 }
0x136d   :  { %2281 = vmatpush1.bf16.msra.mxu1 %v2592_v44 }
0x136e   :  { %2299 = vmatprep.subr.bf16.mxu1 %v2527_v23 }
0x1433   :  { %v1131_v16 = vpop.f32.mrb[6].mxu1 }
0x1434   :  { %v1163_v6 = vadd.f32 %v1131_v16, %v189_v15  ;;  %v1133_v8 = vpop.f32.mrb[7].mxu1 }
0x1435   :  { %v1136_v18 = vadd.f32 %v2619_v51, %v1133_v8 }
0x1436   :  { %2398 = vtanh.f32 %v1163_v6 }
0x1437   :  { %2400 = vtanh.f32 %v1136_v18 }
0x1440   :  { %v2399_v35 = vpop.eup %2398 }
0x1441   :  { %v2401_v19 = vpop.eup %2400  ;;  %v1165_v20 = vmul.f32 %v2399_v35, %v2507_v10 }
0x1442   :  { %v1138_v22 = vmul.f32 %v2401_v19, %v2507_v10 }
0x1443   :  { %v1166_v24 = vadd.f32 %v1165_v20, %v2509_v12 }
0x1444   :  { %v1139_v25 = vadd.f32 %v1138_v22, %v2509_v12 }
0x1445   :  { %1169 = vrot.lane.b32.xlu1 %v1166_v24, %s2445_s1  ;;  %v1167_v47 = vmul.f32 %v1166_v24, %v1047_v62  ;;  %v194_v62 = vadd.f32 %v2502_v4, %v2697_v40 }
0x1446   :  { %1142 = vrot.lane.b32.xlu0 %v1139_v25, %s2445_s1  ;;  %v1140_v30 = vmul.f32 %v1139_v25, %v1020_v1 }
0x14b7   :  { %v1170_v36 = vpop.permute.xlu1 %1169 }
0x14b8   :  { %v1172_v26 = vmul.f32 %v1170_v36, %v1166_v24  ;;  %v1143_v31 = vpop.permute.xlu0 %1142 }
0x14b9   :  { %v1145_v46 = vmul.f32 %v1143_v31, %v1139_v25 }
0x14ba   :  { %1174 = vrot.lane.b32.xlu1 %v1172_v26, %s2446_s9 }
0x14bb   :  { %1147 = vrot.lane.b32.xlu0 %v1145_v46, %s2446_s9 }
0x152c   :  { %v1175_v48 = vpop.permute.xlu1 %1174 }
0x152d   :  { %v1177_v49 = vadd.f32 %v1175_v48, %v1167_v47  ;;  %v1148_v50 = vpop.permute.xlu0 %1147  ;;  %v2920_v48 = vld [vmem:[%s3097_s2] ss:$0 sm:$0xff] }
0x152e   :  { %v1150_v53 = vadd.f32 %v1148_v50, %v1140_v30  ;;  %v199_v30 = vadd.f32 %v2920_v48, %v2695_v38 }
0x152f   :  { %2402 = vtanh.f32 %v1177_v49 }
0x1530   :  { %2404 = vtanh.f32 %v1150_v53 }
0x1539   :  { %v2403_v54 = vpop.eup %2402 }
0x153a   :  { %v2405_v55 = vpop.eup %2404  ;;  %1180 = vrot.lane.b32.xlu1 %v2403_v54, %s2445_s1 }
0x153b   :  { %1153 = vrot.lane.b32.xlu0 %v2405_v55, %s2445_s1 }
0x15ac   :  { %v1181_v37 = vpop.permute.xlu1 %1180 }
0x15ad   :  { %v1183_v56 = vmul.f32 %v1181_v37, %v1166_v24  ;;  %v1154_v57 = vpop.permute.xlu0 %1153 }
0x15ae   :  { %v2873_v58 = vmul.f32 %v1154_v57, %v1139_v25 }
0x15af   :  { %1185 = vrot.lane.b32.xlu0 %v1183_v56, %s2446_s9 }
0x15b0   :  { %1188 = vrot.lane.b32.xlu1 %v2873_v58, %s2445_s1 }
0x1621   :  { %v1186_v59 = vpop.permute.xlu0 %1185 }
0x1622   :  { %v1189_v60 = vpop.permute.xlu1 %1188 }
0x1623   :  { %v1191_v61 = vsel %vm279_vm5, %v1186_v59, %v1189_v60 }
0x1624   :  { %2045 = vmatmul.mubr.msk.f32.vlgmr.msra.gmra.mrb[18].mxu0 %vm281_vm6, %v1191_v61 }
0x1625   :  { %2285 = vmatpush1.bf16.msra.mxu0 %v2538_v27  ;;  %1519 = vmatprep.mubr.f32.mxu0 %v2447_v45 }
0x1626   :  { %2287 = vmatprep.subr.bf16.mxu0 %v2540_v28 }
0x1629   :  { %2289 = vmatpush1.bf16.msra.mxu0 %v2557_v33 }
0x162a   :  { %2291 = vmatprep.subr.bf16.mxu0 %v2561_v34 }
0x162d   :  { %2293 = vmatpush1.bf16.msra.mxu0 %v2577_v39 }
0x162e   :  { %2295 = vmatprep.subr.bf16.mxu0 %v2581_v41 }
0x1631   :  { %2297 = vmatpush1.bf16.msra.mxu0 %v2592_v44 }
0x1632   :  { %2315 = vmatprep.subr.bf16.mxu0 %v2527_v23 }
0x16f7   :  { %v1261_v63 = vpop.f32.mrb[18].mxu0 }
0x16f8   :  { %v1293_v1 = vadd.f32 %v1261_v63, %v194_v62  ;;  %v1263_v2 = vpop.f32.mrb[19].mxu0 }
0x16f9   :  { %v1266_v3 = vadd.f32 %v2619_v51, %v1263_v2 }
0x16fa   :  { %2406 = vtanh.f32 %v1293_v1 }
0x16fb   :  { %2408 = vtanh.f32 %v1266_v3 }
0x1704   :  { %v2407_v32 = vpop.eup %2406 }
0x1705   :  { %v2409_v5 = vpop.eup %2408  ;;  %v1295_v7 = vmul.f32 %v2407_v32, %v2507_v10 }
0x1706   :  { %v1268_v11 = vmul.f32 %v2409_v5, %v2507_v10 }
0x1707   :  { %v1296_v13 = vadd.f32 %v1295_v7, %v2509_v12 }
0x1708   :  { %v1269_v23 = vadd.f32 %v1268_v11, %v2509_v12 }
0x1709   :  { %1299 = vrot.lane.b32.xlu1 %v1296_v13, %s2445_s1  ;;  %v1297_v16 = vmul.f32 %v1296_v13, %v1177_v49 }
0x170a   :  { %1272 = vrot.lane.b32.xlu0 %v1269_v23, %s2445_s1  ;;  %v1270_v8 = vmul.f32 %v1269_v23, %v1150_v53 }
0x177b   :  { %v1300_v4 = vpop.permute.xlu1 %1299 }
0x177c   :  { %v1302_v40 = vmul.f32 %v1300_v4, %v1296_v13  ;;  %v1273_v14 = vpop.permute.xlu0 %1272 }
0x177d   :  { %v1275_v15 = vmul.f32 %v1273_v14, %v1269_v23 }
0x177e   :  { %1304 = vrot.lane.b32.xlu1 %v1302_v40, %s2446_s9 }
0x177f   :  { %1277 = vrot.lane.b32.xlu0 %v1275_v15, %s2446_s9 }
0x17f0   :  { %v1305_v6 = vpop.permute.xlu1 %1304 }
0x17f1   :  { %v1307_v18 = vadd.f32 %v1305_v6, %v1297_v16  ;;  %v1278_v35 = vpop.permute.xlu0 %1277 }
0x17f2   :  { %v1280_v19 = vadd.f32 %v1278_v35, %v1270_v8  ;;  %v204_v8 = vadd.f32 %v2920_v48, %v2701_v43 }
0x17f3   :  { %2410 = vtanh.f32 %v1307_v18 }
0x17f4   :  { %2412 = vtanh.f32 %v1280_v19 }
0x17fd   :  { %v2411_v20 = vpop.eup %2410 }
0x17fe   :  { %v2413_v22 = vpop.eup %2412  ;;  %1310 = vrot.lane.b32.xlu1 %v2411_v20, %s2445_s1 }
0x17ff   :  { %1283 = vrot.lane.b32.xlu0 %v2413_v22, %s2445_s1 }
0x1870   :  { %v1311_v24 = vpop.permute.xlu1 %1310 }
0x1871   :  { %v1313_v25 = vmul.f32 %v1311_v24, %v1296_v13  ;;  %v1284_v36 = vpop.permute.xlu0 %1283 }
0x1872   :  { %v2902_v26 = vmul.f32 %v1284_v36, %v1269_v23 }
0x1873   :  { %1315 = vrot.lane.b32.xlu0 %v1313_v25, %s2446_s9 }
0x1874   :  { %1318 = vrot.lane.b32.xlu1 %v2902_v26, %s2445_s1 }
0x18e5   :  { %v1316_v31 = vpop.permute.xlu0 %1315 }
0x18e6   :  { %v1319_v46 = vpop.permute.xlu1 %1318 }
0x18e7   :  { %v1321_v47 = vsel %vm279_vm5, %v1316_v31, %v1319_v46 }
0x18e8   :  { %2046 = vmatmul.mubr.msk.f32.vlgmr.msra.gmra.mrb[8].mxu1 %vm281_vm6, %v1321_v47 }
0x18e9   :  { %2301 = vmatpush1.bf16.msra.mxu1 %v2538_v27  ;;  %1649 = vmatprep.mubr.f32.mxu1 %v2447_v45 }
0x18ea   :  { %2303 = vmatprep.subr.bf16.mxu1 %v2540_v28 }
0x18ed   :  { %2305 = vmatpush1.bf16.msra.mxu1 %v2557_v33 }
0x18ee   :  { %2307 = vmatprep.subr.bf16.mxu1 %v2561_v34 }
0x18f1   :  { %2309 = vmatpush1.bf16.msra.mxu1 %v2577_v39 }
0x18f2   :  { %2311 = vmatprep.subr.bf16.mxu1 %v2581_v41 }
0x18f5   :  { %2313 = vmatpush1.bf16.msra.mxu1 %v2592_v44 }
0x19bb   :  { %v1391_v49 = vpop.f32.mrb[8].mxu1 }
0x19bc   :  { %v1423_v50 = vadd.f32 %v1391_v49, %v199_v30  ;;  %v1393_v53 = vpop.f32.mrb[9].mxu1 }
0x19bd   :  { %v1396_v54 = vadd.f32 %v2619_v51, %v1393_v53 }
0x19be   :  { %2414 = vtanh.f32 %v1423_v50 }
0x19bf   :  { %2416 = vtanh.f32 %v1396_v54 }
0x19c8   :  { %v2415_v55 = vpop.eup %2414 }
0x19c9   :  { %v2417_v37 = vpop.eup %2416  ;;  %v1425_v56 = vmul.f32 %v2415_v55, %v2507_v10 }
0x19ca   :  { %v1398_v57 = vmul.f32 %v2417_v37, %v2507_v10 }
0x19cb   :  { %v1426_v59 = vadd.f32 %v1425_v56, %v2509_v12 }
0x19cc   :  { %v1399_v60 = vadd.f32 %v1398_v57, %v2509_v12  ;;  %v209_v57 = vadd.f32 %v2920_v48, %v2699_v42 }
0x19cd   :  { %1429 = vrot.lane.b32.xlu1 %v1426_v59, %s2445_s1  ;;  %v1427_v1 = vmul.f32 %v1426_v59, %v1307_v18 }
0x19ce   :  { %1402 = vrot.lane.b32.xlu0 %v1399_v60, %s2445_s1  ;;  %v1400_v3 = vmul.f32 %v1399_v60, %v1280_v19 }
0x1a3f   :  { %v1430_v38 = vpop.permute.xlu1 %1429 }
0x1a40   :  { %v1432_v61 = vmul.f32 %v1430_v38, %v1426_v59  ;;  %v1403_v62 = vpop.permute.xlu0 %1402 }
0x1a41   :  { %v1405_v63 = vmul.f32 %v1403_v62, %v1399_v60 }
0x1a42   :  { %1434 = vrot.lane.b32.xlu1 %v1432_v61, %s2446_s9  ;;  %v2443_v61 = vld [vmem:[%s3099_s4] ss:$0 sm:$0xff] }
0x1a43   :  { %1407 = vrot.lane.b32.xlu0 %v1405_v63, %s2446_s9 }
0x1ab4   :  { %v1435_v2 = vpop.permute.xlu1 %1434 }
0x1ab5   :  { %v1437_v32 = vadd.f32 %v1435_v2, %v1427_v1  ;;  %v1408_v5 = vpop.permute.xlu0 %1407 }
0x1ab6   :  { %v1410_v7 = vadd.f32 %v1408_v5, %v1400_v3 }
0x1ab7   :  { %2418 = vtanh.f32 %v1437_v32 }
0x1ab8   :  { %2420 = vtanh.f32 %v1410_v7 }
0x1ac1   :  { %v2419_v11 = vpop.eup %2418 }
0x1ac2   :  { %v2421_v13 = vpop.eup %2420  ;;  %1440 = vrot.lane.b32.xlu1 %v2419_v11, %s2445_s1 }
0x1ac3   :  { %1413 = vrot.lane.b32.xlu0 %v2421_v13, %s2445_s1 }
0x1b34   :  { %v1441_v23 = vpop.permute.xlu1 %1440 }
0x1b35   :  { %v1443_v4 = vmul.f32 %v1441_v23, %v1426_v59  ;;  %v1414_v40 = vpop.permute.xlu0 %1413 }
0x1b36   :  { %v2935_v14 = vmul.f32 %v1414_v40, %v1399_v60 }
0x1b37   :  { %1445 = vrot.lane.b32.xlu0 %v1443_v4, %s2446_s9 }
0x1b38   :  { %1448 = vrot.lane.b32.xlu1 %v2935_v14, %s2445_s1 }
0x1ba9   :  { %v1446_v15 = vpop.permute.xlu0 %1445 }
0x1baa   :  { %v1449_v16 = vpop.permute.xlu1 %1448 }
0x1bab   :  { %v1451_v6 = vsel %vm279_vm5, %v1446_v15, %v1449_v16 }
0x1bac   :  { %2047 = vmatmul.mubr.msk.f32.vlgmr.msra.gmra.mrb[20].mxu0 %vm281_vm6, %v1451_v6 }
0x1bad   :  { %2317 = vmatpush1.bf16.msra.mxu0 %v2538_v27  ;;  %1779 = vmatprep.mubr.f32.mxu0 %v2447_v45 }
0x1bae   :  { %2319 = vmatprep.subr.bf16.mxu0 %v2540_v28 }
0x1bb1   :  { %2321 = vmatpush1.bf16.msra.mxu0 %v2557_v33 }
0x1bb2   :  { %2323 = vmatprep.subr.bf16.mxu0 %v2561_v34 }
0x1bb5   :  { %2325 = vmatpush1.bf16.msra.mxu0 %v2577_v39 }
0x1bb6   :  { %2327 = vmatprep.subr.bf16.mxu0 %v2581_v41 }
0x1bb9   :  { %2329 = vmatpush1.bf16.msra.mxu0 %v2592_v44 }
0x1c7f   :  { %v1521_v18 = vpop.f32.mrb[20].mxu0 }
0x1c80   :  { %v1553_v35 = vadd.f32 %v1521_v18, %v204_v8  ;;  %v1523_v27 = vpop.f32.mrb[21].mxu0 }
0x1c81   :  { %v1526_v45 = vadd.f32 %v2619_v51, %v1523_v27 }
0x1c82   :  { %2422 = vtanh.f32 %v1553_v35 }
0x1c83   :  { %2424 = vtanh.f32 %v1526_v45 }
0x1c8c   :  { %v2423_v28 = vpop.eup %2422 }
0x1c8d   :  { %v2425_v33 = vpop.eup %2424  ;;  %v1555_v34 = vmul.f32 %v2423_v28, %v2507_v10 }
0x1c8e   :  { %v1528_v39 = vmul.f32 %v2425_v33, %v2507_v10 }
0x1c8f   :  { %v1556_v41 = vadd.f32 %v1555_v34, %v2509_v12 }
0x1c90   :  { %v1529_v44 = vadd.f32 %v1528_v39, %v2509_v12 }
0x1c91   :  { %1559 = vrot.lane.b32.xlu1 %v1556_v41, %s2445_s1  ;;  %v1557_v22 = vmul.f32 %v1556_v41, %v1437_v32 }
0x1c92   :  { %1532 = vrot.lane.b32.xlu0 %v1529_v44, %s2445_s1  ;;  %v1530_v25 = vmul.f32 %v1529_v44, %v1410_v7 }
0x1d03   :  { %v1560_v43 = vpop.permute.xlu1 %1559 }
0x1d04   :  { %v1562_v19 = vmul.f32 %v1560_v43, %v1556_v41  ;;  %v1533_v20 = vpop.permute.xlu0 %1532 }
0x1d05   :  { %v1535_v51 = vmul.f32 %v1533_v20, %v1529_v44 }
0x1d06   :  { %1564 = vrot.lane.b32.xlu1 %v1562_v19, %s2446_s9 }
0x1d07   :  { %1537 = vrot.lane.b32.xlu0 %v1535_v51, %s2446_s9 }
0x1d78   :  { %v1565_v24 = vpop.permute.xlu1 %1564 }
0x1d79   :  { %v1567_v36 = vadd.f32 %v1565_v24, %v1557_v22  ;;  %v1538_v31 = vpop.permute.xlu0 %1537  ;;  %v1823_v24 = vld [vmem:[%s3100_s5] sm:$0xff] }
0x1d7a   :  { %v1540_v46 = vadd.f32 %v1538_v31, %v1530_v25 }
0x1d7b   :  { %2426 = vtanh.f32 %v1567_v36 }
0x1d7c   :  { %2428 = vtanh.f32 %v1540_v46 }
0x1d85   :  { %v2427_v47 = vpop.eup %2426 }
0x1d86   :  { %v2429_v30 = vpop.eup %2428  ;;  %1570 = vrot.lane.b32.xlu1 %v2427_v47, %s2445_s1 }
0x1d87   :  { %1543 = vrot.lane.b32.xlu0 %v2429_v30, %s2445_s1 }
0x1df8   :  { %v1571_v49 = vpop.permute.xlu1 %1570 }
0x1df9   :  { %v1573_v50 = vmul.f32 %v1571_v49, %v1556_v41  ;;  %v1544_v53 = vpop.permute.xlu0 %1543 }
0x1dfa   :  { %v2963_v54 = vmul.f32 %v1544_v53, %v1529_v44 }
0x1dfb   :  { %1575 = vrot.lane.b32.xlu0 %v1573_v50, %s2446_s9 }
0x1dfc   :  { %1578 = vrot.lane.b32.xlu1 %v2963_v54, %s2445_s1 }
0x1e6d   :  { %v1576_v55 = vpop.permute.xlu0 %1575 }
0x1e6e   :  { %v1579_v37 = vpop.permute.xlu1 %1578 }
0x1e6f   :  { %v1581_v56 = vsel %vm279_vm5, %v1576_v55, %v1579_v37 }
0x1e70   :  { %2048 = vmatmul.mubr.msk.f32.vlgmr.msra.gmra.mrb[10].mxu1 %vm281_vm6, %v1581_v56 }
0x1f43   :  { %v1651_v59 = vpop.f32.mrb[10].mxu1 }
0x1f44   :  { %v1683_v60 = vadd.f32 %v1651_v59, %v209_v57  ;;  %v1653_v38 = vpop.f32.mrb[11].mxu1 }
0x1f45   :  { %v1656_v62 = vadd.f32 %v2443_v61, %v1653_v38 }
0x1f46   :  { %2430 = vtanh.f32 %v1683_v60 }
0x1f47   :  { %2432 = vtanh.f32 %v1656_v62 }
0x1f50   :  { %v2431_v63 = vpop.eup %2430 }
0x1f51   :  { %v2433_v1 = vpop.eup %2432  ;;  %v1685_v2 = vmul.f32 %v2431_v63, %v2507_v10 }
0x1f52   :  { %v1658_v3 = vmul.f32 %v2433_v1, %v2507_v10 }
0x1f53   :  { %v1686_v32 = vadd.f32 %v1685_v2, %v2509_v12 }
0x1f54   :  { %v1659_v42 = vadd.f32 %v1658_v3, %v2509_v12  ;;  %v2050_v3 = vld [vmem:[%s3101_s6] ss:$0 sm:$0xff] }
0x1f55   :  { %1689 = vrot.lane.b32.xlu1 %v1686_v32, %s2445_s1  ;;  %v1687_v13 = vmul.f32 %v1686_v32, %v1567_v36 }
0x1f56   :  { %1662 = vrot.lane.b32.xlu0 %v1659_v42, %s2445_s1  ;;  %v1660_v4 = vmul.f32 %v1659_v42, %v1540_v46 }
0x1fc7   :  { %v1690_v48 = vpop.permute.xlu1 %1689 }
0x1fc8   :  { %v1692_v5 = vmul.f32 %v1690_v48, %v1686_v32  ;;  %v1663_v7 = vpop.permute.xlu0 %1662 }
0x1fc9   :  { %v1665_v11 = vmul.f32 %v1663_v7, %v1659_v42 }
0x1fca   :  { %1694 = vrot.lane.b32.xlu1 %v1692_v5, %s2446_s9 }
0x1fcb   :  { %1667 = vrot.lane.b32.xlu0 %v1665_v11, %s2446_s9 }
0x203c   :  { %v1695_v23 = vpop.permute.xlu1 %1694 }
0x203d   :  { %v1697_v40 = vadd.f32 %v1695_v23, %v1687_v13  ;;  %v1668_v15 = vpop.permute.xlu0 %1667 }
0x203e   :  { %v1670_v16 = vadd.f32 %v1668_v15, %v1660_v4 }
0x203f   :  { %2434 = vtanh.f32 %v1697_v40 }
0x2040   :  { %2436 = vtanh.f32 %v1670_v16 }
0x2049   :  { %v2435_v6 = vpop.eup %2434 }
0x204a   :  { %v2437_v8 = vpop.eup %2436  ;;  %1700 = vrot.lane.b32.xlu1 %v2435_v6, %s2445_s1 }
0x204b   :  { %1673 = vrot.lane.b32.xlu0 %v2437_v8, %s2445_s1 }
0x20bc   :  { %v1701_v18 = vpop.permute.xlu1 %1700 }
0x20bd   :  { %v1703_v35 = vmul.f32 %v1701_v18, %v1686_v32  ;;  %v1674_v27 = vpop.permute.xlu0 %1673 }
0x20be   :  { %v2985_v45 = vmul.f32 %v1674_v27, %v1659_v42 }
0x20bf   :  { %1705 = vrot.lane.b32.xlu0 %v1703_v35, %s2446_s9 }
0x20c0   :  { %1708 = vrot.lane.b32.xlu1 %v2985_v45, %s2445_s1 }
0x2131   :  { %v1706_v28 = vpop.permute.xlu0 %1705 }
0x2132   :  { %v1709_v33 = vpop.permute.xlu1 %1708 }
0x2133   :  { %v1711_v34 = vsel %vm279_vm5, %v1706_v28, %v1709_v33 }
0x2134   :  { %2049 = vmatmul.mubr.msk.f32.vlgmr.msra.gmra.mrb[22].mxu0 %vm281_vm6, %v1711_v34 }
0x2207   :  { %v1781_v39 = vpop.f32.mrb[22].mxu0 }
0x2208   :  { %v1782_v41 = vpop.f32.mrb[23].mxu0 }
0x2209   :  { %v1785_v44 = vadd.f32 %v2443_v61, %v1782_v41 }
0x220b   :  { %2438 = vtanh.f32 %v1785_v44 }
0x2215   :  { %v2439_v43 = vpop.eup %2438 }
0x2216   :  { %v1787_v19 = vmul.f32 %v2439_v43, %v2507_v10  ;;  %v1824_v10 = vld [vmem:[%s3100_s5 + $0x8] sm:$0xff] }
0x2218   :  { %v1788_v20 = vadd.f32 %v1787_v19, %v2509_v12  ;;  %v2330_v12 = vpack.c.bf16 %v1824_v10, %v1823_v24 }
0x221a   :  { %1791 = vrot.lane.b32.xlu0 %v1788_v20, %s2445_s1  ;;  %2331 = vmatprep.subr.bf16.mxu0 %v2330_v12 }
0x221b   :  { %2338 = vmatprep.subr.bf16.mxu1 %v2330_v12  ;;  %2333 = vmatpush3.bf16.msra.mxu0 %v2330_v12 }
0x221c   :  { %2340 = vmatpush3.bf16.msra.mxu1 %v2330_v12 }
0x228c   :  { %v1792_v51 = vpop.permute.xlu0 %1791 }
0x228d   :  { %v1794_v22 = vmul.f32 %v1792_v51, %v1788_v20 }
0x228f   :  { %1796 = vrot.lane.b32.xlu1 %v1794_v22, %s2446_s9 }
0x2293   :  { %638 = vrot.lane.b32.xlu1 %v2757_v0, %s2446_s9  ;;  %v1825_v0 = vld [vmem:[%s3100_s5 + $0x10] sm:$0xff] }
0x2297   :  { %898 = vrot.lane.b32.xlu1 %v2815_v21, %s2446_s9  ;;  %v1826_v21 = vld [vmem:[%s3100_s5 + $0x18] sm:$0xff] }
0x2298   :  { %v2334_v25 = vpack.c.bf16 %v1826_v21, %v1825_v0 }
0x229a   :  { %2335 = vmatprep.subr.bf16.mxu0 %v2334_v25  ;;  %2339 = vmatprep.subr.bf16.mxu1 %v2334_v25 }
0x229b   :  { %1158 = vrot.lane.b32.xlu1 %v2873_v58, %s2446_s9  ;;  %2337 = vmatpush3.bf16.msra.mxu0 %v2334_v25  ;;  %v1789_v58 = vmul.f32 %v1788_v20, %v1670_v16 }
0x229c   :  { %2341 = vmatpush3.bf16.msra.mxu1 %v2334_v25 }
0x229f   :  { %1418 = vrot.lane.b32.xlu1 %v2935_v14, %s2446_s9 }
0x22a3   :  { %378 = vrot.lane.b32.xlu1 %v2680_v29, %s2446_s9 }
0x22a7   :  { %508 = vrot.lane.b32.xlu1 %v2728_v17, %s2446_s9 }
0x2301   :  { %v1797_v36 = vpop.permute.xlu1 %1796 }
0x2302   :  { %v1799_v31 = vadd.f32 %v1797_v36, %v1789_v58 }
0x2304   :  { %2440 = vtanh.f32 %v1799_v31 }
0x2305   :  { %v639_v46 = vpop.permute.xlu1 %638 }
0x2306   :  { %641 = vst.msk [vmem:[#allocation3 + $0x10] sm:$0xff] %vm279_vm5, %v639_v46 }
0x2309   :  { %v899_v47 = vpop.permute.xlu1 %898 }
0x230a   :  { %901 = vst.msk [vmem:[#allocation3 + $0x20] sm:$0xff] %vm279_vm5, %v899_v47 }
0x230d   :  { %v1159_v30 = vpop.permute.xlu1 %1158  ;;  %v1813_v14 = vld [vmem:[#allocation3 + $0x10] sm:$0xff] }
0x230e   :  { %v2441_v49 = vpop.eup %2440  ;;  %1161 = vst.msk [vmem:[#allocation3 + $0x30] sm:$0xff] %vm279_vm5, %v1159_v30  ;;  %2123 = vmatprep.mubr.msk.f32.mxu1 %vm279_vm5, %v1813_v14 }
0x230f   :  { %1802 = vrot.lane.b32.xlu0 %v2441_v49, %s2445_s1 }
0x2311   :  { %v1419_v29 = vpop.permute.xlu1 %1418 }
0x2312   :  { %1421 = vst.msk [vmem:[#allocation3 + $0x40] sm:$0xff] %vm279_vm5, %v1419_v29 }
0x2313   :  { %768 = vrot.lane.b32.xlu0 %v2786_v52, %s2446_s9 }
0x2315   :  { %v379_v17 = vpop.permute.xlu1 %378  ;;  %v1817_v38 = vld [vmem:[#allocation3 + $0x30] sm:$0xff] }
0x2316   :  { %381 = vst.msk [vmem:[#allocation3] sm:$0xff] %vm279_vm5, %v379_v17 }
0x2317   :  { %1028 = vrot.lane.b32.xlu0 %v2844_v9, %s2446_s9 }
0x2319   :  { %v509_v50 = vpop.permute.xlu1 %508  ;;  %v1819_v63 = vld [vmem:[#allocation3 + $0x40] sm:$0xff] }
0x231a   :  { %511 = vst.msk [vmem:[#allocation3 + $0x8] sm:$0xff] %vm279_vm5, %v509_v50 }
0x231b   :  { %1288 = vrot.lane.b32.xlu0 %v2902_v26, %s2446_s9 }
0x231d   :  { %v1811_v53 = vld [vmem:[#allocation3] sm:$0xff] }
0x231e   :  { %2120 = vmatprep.mubr.msk.f32.mxu0 %vm279_vm5, %v1811_v53 }
0x231f   :  { %1548 = vrot.lane.b32.xlu0 %v2963_v54, %s2446_s9  ;;  %v1815_v54 = vld [vmem:[#allocation3 + $0x20] sm:$0xff] }
0x2321   :  { %v1812_v55 = vld [vmem:[#allocation3 + $0x8] sm:$0xff] }
0x2322   :  { %2121 = vmatmul.mubr.msk.f32.vlgmr.msra.gmra.mrb[24].mxu0 %vm279_vm5, %v1812_v55 }
0x2323   :  { %1678 = vrot.lane.b32.xlu0 %v2985_v45, %s2446_s9 }
0x2381   :  { %v1803_v52 = vpop.permute.xlu0 %1802 }
0x2382   :  { %v1805_v9 = vmul.f32 %v1803_v52, %v1788_v20 }
0x2384   :  { %1807 = vrot.lane.b32.xlu0 %v1805_v9, %s2446_s9 }
0x2385   :  { %v769_v37 = vpop.permute.xlu0 %768 }
0x2386   :  { %771 = vst.msk [vmem:[#allocation3 + $0x18] sm:$0xff] %vm279_vm5, %v769_v37 }
0x2389   :  { %v1029_v26 = vpop.permute.xlu0 %1028 }
0x238a   :  { %1031 = vst.msk [vmem:[#allocation3 + $0x28] sm:$0xff] %vm279_vm5, %v1029_v26 }
0x238d   :  { %v1289_v56 = vpop.permute.xlu0 %1288  ;;  %v1814_v57 = vld [vmem:[#allocation3 + $0x18] sm:$0xff] }
0x238e   :  { %1291 = vst.msk [vmem:[#allocation3 + $0x38] sm:$0xff] %vm279_vm5, %v1289_v56  ;;  %2124 = vmatmul.mubr.msk.f32.vlgmr.msra.gmra.mrb[12].mxu1 %vm279_vm5, %v1814_v57 }
0x238f   :  { %2126 = vmatprep.mubr.msk.f32.mxu1 %vm279_vm5, %v1815_v54 }
0x2391   :  { %v1549_v59 = vpop.permute.xlu0 %1548  ;;  %v1816_v60 = vld [vmem:[#allocation3 + $0x28] sm:$0xff] }
0x2392   :  { %1551 = vst.msk [vmem:[#allocation3 + $0x48] sm:$0xff] %vm279_vm5, %v1549_v59  ;;  %2127 = vmatmul.mubr.msk.f32.gmra.mrb[14].mxu1 %vm279_vm5, %v1816_v60 }
0x2393   :  { %2129 = vmatprep.mubr.msk.f32.mxu1 %vm279_vm5, %v1817_v38 }
0x2395   :  { %v1679_v61 = vpop.permute.xlu0 %1678  ;;  %v1818_v62 = vld [vmem:[#allocation3 + $0x38] sm:$0xff] }
0x2396   :  { %1681 = vst.msk [vmem:[#allocation3 + $0x50] sm:$0xff] %vm279_vm5, %v1679_v61  ;;  %2130 = vmatmul.mubr.msk.f32.gmra.mrb[16].mxu1 %vm279_vm5, %v1818_v62 }
0x2397   :  { %2132 = vmatprep.mubr.msk.f32.mxu1 %vm279_vm5, %v1819_v63 }
0x2399   :  { %v1820_v1 = vld [vmem:[#allocation3 + $0x48] sm:$0xff] }
0x239a   :  { %2133 = vmatmul.mubr.msk.f32.gmra.mrb[18].mxu1 %vm279_vm5, %v1820_v1 }
0x239d   :  { %v1821_v2 = vld [vmem:[#allocation3 + $0x50] sm:$0xff] }
0x239e   :  { %2135 = vmatprep.mubr.msk.f32.mxu1 %vm279_vm5, %v1821_v2 }
0x23f5   :  { %v2122_v32 = vpop.f32.mrb[24].mxu0 }
0x23f6   :  { %v1942_v42 = vadd.f32 %v2122_v32, %v2050_v3  ;;  %v1936_v48 = vpop.f32.mrb[25].mxu0  ;;  %v1808_v5 = vpop.permute.xlu0 %1807 }
0x23f7   :  { %v1937_v7 = vadd.f32 %v2050_v3, %v1936_v48  ;;  %1810 = vst.msk [vmem:[#allocation3 + $0x58] sm:$0xff] %vm279_vm5, %v1808_v5 }
0x23f8   :  { %v1996_v11 = vmax.f32 %v1942_v42, 0.0 }
0x23f9   :  { %v1995_v13 = vmax.f32 %v1937_v7, 0.0 }
0x23fa   :  { %2008 = vst [vmem:[%s3102_s7 + $0x8] sm:$0xff] %v1996_v11 }
0x23fb   :  { %2007 = vst [vmem:[%s3102_s7] sm:$0xff] %v1995_v13 }
0x23fe   :  { %v1822_v23 = vld [vmem:[#allocation3 + $0x58] sm:$0xff] }
0x23ff   :  { %2136 = vmatmul.mubr.msk.f32.gmra.mrb[20].mxu1 %vm279_vm5, %v1822_v23 }
0x2461   :  { %v2125_v4 = vpop.f32.mrb[12].mxu1 }
0x2462   :  { %v1952_v40 = vadd.f32 %v2125_v4, %v2050_v3  ;;  %v1946_v15 = vpop.f32.mrb[13].mxu1 }
0x2463   :  { %v1947_v16 = vadd.f32 %v2050_v3, %v1946_v15 }
0x2464   :  { %v1998_v6 = vmax.f32 %v1952_v40, 0.0 }
0x2465   :  { %v1997_v8 = vmax.f32 %v1947_v16, 0.0  ;;  %v2128_v18 = vpop.f32.mrb[14].mxu1 }
0x2466   :  { %2010 = vst [vmem:[%s3102_s7 + $0x18] sm:$0xff] %v1998_v6  ;;  %v1962_v35 = vadd.f32 %v2128_v18, %v2050_v3  ;;  %v1956_v27 = vpop.f32.mrb[15].mxu1 }
0x2467   :  { %2009 = vst [vmem:[%s3102_s7 + $0x10] sm:$0xff] %v1997_v8  ;;  %v1957_v45 = vadd.f32 %v2050_v3, %v1956_v27 }
0x2468   :  { %v2000_v28 = vmax.f32 %v1962_v35, 0.0 }
0x2469   :  { %v1999_v33 = vmax.f32 %v1957_v45, 0.0  ;;  %v2131_v34 = vpop.f32.mrb[16].mxu1 }
0x246a   :  { %2012 = vst [vmem:[%s3102_s7 + $0x28] sm:$0xff] %v2000_v28  ;;  %v1972_v39 = vadd.f32 %v2131_v34, %v2050_v3  ;;  %v1966_v41 = vpop.f32.mrb[17].mxu1 }
0x246b   :  { %2011 = vst [vmem:[%s3102_s7 + $0x20] sm:$0xff] %v1999_v33  ;;  %v1967_v44 = vadd.f32 %v2050_v3, %v1966_v41 }
0x246c   :  { %v2002_v43 = vmax.f32 %v1972_v39, 0.0 }
0x246d   :  { %v2001_v19 = vmax.f32 %v1967_v44, 0.0  ;;  %v2134_v20 = vpop.f32.mrb[18].mxu1 }
0x246e   :  { %2014 = vst [vmem:[%s3102_s7 + $0x38] sm:$0xff] %v2002_v43  ;;  %v1982_v51 = vadd.f32 %v2134_v20, %v2050_v3  ;;  %v1976_v22 = vpop.f32.mrb[19].mxu1 }
0x246f   :  { %2013 = vst [vmem:[%s3102_s7 + $0x30] sm:$0xff] %v2001_v19  ;;  %v1977_v24 = vadd.f32 %v2050_v3, %v1976_v22 }
0x2470   :  { %v2004_v10 = vmax.f32 %v1982_v51, 0.0 }
0x2471   :  { %v2003_v12 = vmax.f32 %v1977_v24, 0.0 }
0x2472   :  { %2016 = vst [vmem:[%s3102_s7 + $0x48] sm:$0xff] %v2004_v10 }
0x2473   :  { %2015 = vst [vmem:[%s3102_s7 + $0x40] sm:$0xff] %v2003_v12 }
0x24d2   :  { %v2137_v0 = vpop.f32.mrb[20].mxu1 }
0x24d3   :  { %v1992_v21 = vadd.f32 %v2137_v0, %v2050_v3  ;;  %v1986_v25 = vpop.f32.mrb[21].mxu1 }
0x24d4   :  { %v1987_v58 = vadd.f32 %v2050_v3, %v1986_v25 }
0x24d5   :  { %v2006_v36 = vmax.f32 %v1992_v21, 0.0 }
0x24d6   :  { %v2005_v31 = vmax.f32 %v1987_v58, 0.0 }
0x24d7   :  { %2018 = vst [vmem:[%s3102_s7 + $0x58] sm:$0xff] %v2006_v36 }
0x24d8   :  { %2017 = vst [vmem:[%s3102_s7 + $0x50] sm:$0xff] %v2005_v31 }

</bundles_post_ra>
